<compile_context>
chip_gen: v7x
topology: tpu7x:2x2x1
jax: 0.10.0
libtpu: 0.0.40
codegen_flags: <defaults>
</compile_context>

<pallas_src>
import functools

import jax
import jax.numpy as jnp
from jax import lax
from jax.experimental import pallas as pl
from jax.experimental.pallas import tpu as pltpu

# Stand-in for the external constant C.MINIMUM_VALUE used by the reference.
MINIMUM_VALUE = -1e9


def _mha_kernel(q_ref, k_ref, wq_ref, wkv_ref, mask_ref, rel_ref,
                out_ref, sim_ref, *, num_heads):
    # Block shapes seen by the kernel (one batch per grid step):
    #   q_ref    (1, Tq, D)        k_ref   (1, Tk, D)
    #   wq_ref   (D, U)  [pre-transposed, pre-scaled by 1/sqrt(key_dim)]
    #   wkv_ref  (D, 2U) [concat of Wk^T and Wv^T]
    #   mask_ref (1, Tq, Tk)       rel_ref (1, Tq, Tk)
    #   out_ref  (1, Tq, U)        sim_ref (h, 1, Tq, Tk)
    q = q_ref[0]                     # (Tq, D)
    k = k_ref[0]                     # (Tk, D)
    num_units = wq_ref.shape[1]
    d = num_units // num_heads

    # Fused full-width projections (MXU).  Wq already carries the 1/sqrt(dk)
    # scale, so no per-(Tq,Tk) scaling multiply is needed later.
    Q = jnp.dot(q, wq_ref[...], preferred_element_type=jnp.float32)    # (Tq, U)
    KV = jnp.dot(k, wkv_ref[...], preferred_element_type=jnp.float32)  # (Tk, 2U)
    K = KV[:, :num_units]
    V = KV[:, num_units:]

    # Batch-level terms, computed once (not once per head).
    rel = rel_ref[0]                                                   # (Tq, Tk)
    rel_sig = pl.reciprocal(1.0 + jnp.exp(-rel), approx=True)          # sigmoid
    mask_pos = mask_ref[0] > 0

    head_outs = []
    for i in range(num_heads):       # static, fully unrolled (h is small)
        lo = i * d
        Qi = Q[:, lo:lo + d]         # (Tq, d)
        Ki = K[:, lo:lo + d]         # (Tk, d)
        Vi = V[:, lo:lo + d]         # (Tk, d)

        # Q_i @ K_i^T without materializing an explicit transpose of K.
        attn = lax.dot_general(Qi, Ki, (((1,), (1,)), ((), ())),
                               preferred_element_type=jnp.float32)     # (Tq, Tk)
        attn = attn * rel_sig
        attn = jnp.where(mask_pos, attn, jnp.float32(MINIMUM_VALUE))

        # Numerically-stable softmax over the key axis.
        m = jnp.max(attn, axis=-1, keepdims=True)
        e = jnp.exp(attn - m)
        denom = jnp.sum(e, axis=-1, keepdims=True)
        sim = e * pl.reciprocal(denom, approx=True)                    # (Tq, Tk)
        sim_ref[i, 0] = sim

        # TODO(synk): dropout (p=0.5) is identity in eval mode; training-mode
        # dropout would use pltpu.prng_seed / pltpu.prng_random_bits on sim.
        head_outs.append(jnp.dot(sim, Vi, preferred_element_type=jnp.float32))

    # Lane-dense (Tq, num_units) store, heads concatenated head-major along the
    # feature dim — identical to torch.cat(output.split(B, dim=0), dim=2).
    out_ref[0] = jnp.concatenate(head_outs, axis=-1)


def multi_head_attention(query, keys, mask, relative_embedding,
                         wq, wk, wv, *, num_units, h, key_dim):
    """Returns (output (B, Tq, num_units), similarity (h*B, Tq, Tk))."""
    B, Tq, D = query.shape
    _, Tk, _ = keys.shape

    # torch Linear: y = x @ W^T.  Pre-transpose the weights and fold the
    # 1/sqrt(key_dim) scale into Wq; concatenate Wk^T|Wv^T for one matmul.
    inv_sqrt = 1.0 / (float(key_dim) ** 0.5)
    wq_t = (wq.T * jnp.float32(inv_sqrt)).astype(jnp.float32)   # (D, U)
    wkv_t = jnp.concatenate([wk.T, wv.T], axis=1)               # (D, 2U)

    kernel = functools.partial(_mha_kernel, num_heads=h)

    out, sim4 = pl.pallas_call(
        kernel,
        out_shape=(
            jax.ShapeDtypeStruct((B, Tq, num_units), jnp.float32),
            jax.ShapeDtypeStruct((h, B, Tq, Tk), jnp.float32),
        ),
        grid_spec=pltpu.PrefetchScalarGridSpec(
            num_scalar_prefetch=0,
            grid=(B,),
            in_specs=[
                pl.BlockSpec((1, Tq, D), lambda bi: (bi, 0, 0)),        # query
                pl.BlockSpec((1, Tk, D), lambda bi: (bi, 0, 0)),        # keys
                pl.BlockSpec((D, num_units), lambda bi: (0, 0)),        # Wq^T*s
                pl.BlockSpec((D, 2 * num_units), lambda bi: (0, 0)),    # [Wk|Wv]^T
                pl.BlockSpec((1, Tq, Tk), lambda bi: (bi, 0, 0)),       # mask
                pl.BlockSpec((1, Tq, Tk), lambda bi: (bi, 0, 0)),       # rel emb
            ],
            out_specs=[
                pl.BlockSpec((1, Tq, num_units), lambda bi: (bi, 0, 0)),
                pl.BlockSpec((h, 1, Tq, Tk), lambda bi: (0, bi, 0, 0)),
            ],
        ),
        compiler_params=pltpu.CompilerParams(
            dimension_semantics=("parallel",)),
    )(query, keys, wq_t, wkv_t, mask, relative_embedding)

    # (h, B, Tq, Tk) -> (h*B, Tq, Tk): contiguous merge, no transpose pass.
    sim = sim4.reshape(h * B, Tq, Tk)
    return out, sim


def _reference(query, keys, mask, rel, wq, wk, wv, *, num_units, h, key_dim):
    """Pure-JAX replica of the PyTorch forward (eval mode) for validation."""
    Q, K, V = query @ wq.T, keys @ wk.T, keys @ wv.T
    cat = lambda x: jnp.concatenate(jnp.split(x, h, axis=-1), axis=0)
    Qh, Kh, Vh = cat(Q), cat(K), cat(V)
    attn = Qh @ jnp.swapaxes(Kh, 1, 2)
    attn = attn * jnp.tile(jax.nn.sigmoid(rel), (h, 1, 1))
    attn = attn / jnp.sqrt(jnp.float32(key_dim))
    attn = jnp.where(jnp.tile(mask, (h, 1, 1)) > 0, attn,
                     jnp.float32(MINIMUM_VALUE))
    sim = jax.nn.softmax(attn, axis=-1)
    out = sim @ Vh
    out = jnp.concatenate(jnp.split(out, h, axis=0), axis=2)
    return out, sim


if __name__ == "__main__":
    # Module config: query_dim == key_dim == num_units, num_units % h == 0.
    B, Tq, Tk = 2, 16, 16
    num_units = 64
    query_dim = key_dim = num_units
    h = 8

    root = jax.random.PRNGKey(0)
    kq, kk, km, kr, k1, k2, k3 = jax.random.split(root, 7)

    query = jax.random.normal(kq, (B, Tq, query_dim), dtype=jnp.float32)
    keys = jax.random.normal(kk, (B, Tk, key_dim), dtype=jnp.float32)
    mask = jax.random.bernoulli(km, 0.8, (B, Tq, Tk)).astype(jnp.float32)
    rel = jax.random.normal(kr, (B, Tq, Tk), dtype=jnp.float32)

    # Deterministic nn.Linear(bias=False) init: U(-1/sqrt(fan_in), 1/sqrt(fan_in)).
    bound = 1.0 / (query_dim ** 0.5)
    wq = jax.random.uniform(k1, (num_units, query_dim), jnp.float32, -bound, bound)
    wk = jax.random.uniform(k2, (num_units, key_dim), jnp.float32, -bound, bound)
    wv = jax.random.uniform(k3, (num_units, key_dim), jnp.float32, -bound, bound)

    out, sim = multi_head_attention(
        query, keys, mask, rel, wq, wk, wv,
        num_units=num_units, h=h, key_dim=key_dim)
    jax.block_until_ready((out, sim))

    out_ref, sim_ref = _reference(
        query, keys, mask, rel, wq, wk, wv,
        num_units=num_units, h=h, key_dim=key_dim)

    assert out.shape == (B, Tq, num_units)
    assert sim.shape == (h * B, Tq, Tk)
    # Tolerance loosened slightly (2e-3) for the approx (EUP) reciprocals.
    assert jnp.allclose(out, out_ref, atol=2e-3, rtol=2e-3)
    assert jnp.allclose(sim, sim_ref, atol=2e-3, rtol=2e-3)
    print("KERNEL_OK")
</pallas_src>

<mosaic_0001>
module attributes {stable_mosaic.version = 11 : i64} {
  func.func @_mha_kernel(%arg0: i32, %arg1: memref<1x16x64xf32, #tpu.memory_space<vmem>>, %arg2: memref<1x16x64xf32, #tpu.memory_space<vmem>>, %arg3: memref<64x64xf32, #tpu.memory_space<vmem>>, %arg4: memref<64x128xf32, #tpu.memory_space<vmem>>, %arg5: memref<1x16x16xf32, #tpu.memory_space<vmem>>, %arg6: memref<1x16x16xf32, #tpu.memory_space<vmem>>, %arg7: memref<1x16x64xf32, #tpu.memory_space<vmem>>, %arg8: memref<8x1x16x16xf32, #tpu.memory_space<vmem>>) attributes {dimension_semantics = [#tpu.dimension_semantics<parallel>], iteration_bounds = array<i64: 2>, scalar_prefetch = 0 : i64, scratch_operands = 0 : i64, tpu.core_type = #tpu.core_type<tc>, window_params = [{transform_indices = @transform_0, window_bounds = array<i64: 1, 16, 64>}, {transform_indices = @transform_1, window_bounds = array<i64: 1, 16, 64>}, {pipeline_mode = #tpu.pipeline_mode<synchronous>, transform_indices = @transform_2, window_bounds = array<i64: 64, 64>}, {pipeline_mode = #tpu.pipeline_mode<synchronous>, transform_indices = @transform_3, window_bounds = array<i64: 64, 128>}, {transform_indices = @transform_4, window_bounds = array<i64: 1, 16, 16>}, {transform_indices = @transform_5, window_bounds = array<i64: 1, 16, 16>}, {transform_indices = @transform_6, window_bounds = array<i64: 1, 16, 64>}, {transform_indices = @transform_7, window_bounds = array<i64: 8, 1, 16, 16>}]} {
    %c0 = arith.constant 0 : index
    %c0_0 = arith.constant 0 : index
    %c0_1 = arith.constant 0 : index
    %0 = vector.load %arg1[%c0, %c0_0, %c0_1] : memref<1x16x64xf32, #tpu.memory_space<vmem>>, vector<1x16x64xf32>
    %1 = vector.shape_cast %0 : vector<1x16x64xf32> to vector<16x64xf32>
    %c0_2 = arith.constant 0 : index
    %c0_3 = arith.constant 0 : index
    %c0_4 = arith.constant 0 : index
    %2 = vector.load %arg2[%c0_2, %c0_3, %c0_4] : memref<1x16x64xf32, #tpu.memory_space<vmem>>, vector<1x16x64xf32>
    %3 = vector.shape_cast %2 : vector<1x16x64xf32> to vector<16x64xf32>
    %c0_5 = arith.constant 0 : index
    %c0_6 = arith.constant 0 : index
    %4 = vector.load %arg3[%c0_5, %c0_6] : memref<64x64xf32, #tpu.memory_space<vmem>>, vector<64x64xf32>
    %cst = arith.constant dense<0.000000e+00> : vector<16x64xf32>
    %5 = tpu.matmul %1, %4, %cst {dimension_numbers = #tpu.dot_dimension_numbers<[1], [0], [0], [1], [0, 0, 1, 1], [], []>} : vector<16x64xf32>, vector<64x64xf32>, vector<16x64xf32> -> vector<16x64xf32>
    %c0_7 = arith.constant 0 : index
    %c0_8 = arith.constant 0 : index
    %6 = vector.load %arg4[%c0_7, %c0_8] : memref<64x128xf32, #tpu.memory_space<vmem>>, vector<64x128xf32>
    %cst_9 = arith.constant dense<0.000000e+00> : vector<16x128xf32>
    %7 = tpu.matmul %3, %6, %cst_9 {dimension_numbers = #tpu.dot_dimension_numbers<[1], [0], [0], [1], [0, 0, 1, 1], [], []>} : vector<16x64xf32>, vector<64x128xf32>, vector<16x128xf32> -> vector<16x128xf32>
    %8 = vector.extract_strided_slice %7 {offsets = [0, 0], sizes = [16, 64], strides = [1, 1]} : vector<16x128xf32> to vector<16x64xf32>
    %9 = vector.extract_strided_slice %7 {offsets = [0, 64], sizes = [16, 64], strides = [1, 1]} : vector<16x128xf32> to vector<16x64xf32>
    %c0_10 = arith.constant 0 : index
    %c0_11 = arith.constant 0 : index
    %c0_12 = arith.constant 0 : index
    %10 = vector.load %arg6[%c0_10, %c0_11, %c0_12] : memref<1x16x16xf32, #tpu.memory_space<vmem>>, vector<1x16x16xf32>
    %11 = vector.shape_cast %10 : vector<1x16x16xf32> to vector<16x16xf32>
    %cst_13 = arith.constant 0.000000e+00 : f32
    %12 = vector.broadcast %cst_13 : f32 to vector<16x16xf32>
    %13 = arith.subf %12, %11 : vector<16x16xf32>
    %14 = math.exp %13 : vector<16x16xf32>
    %cst_14 = arith.constant 1.000000e+00 : f32
    %15 = vector.broadcast %cst_14 : f32 to vector<16x16xf32>
    %16 = arith.addf %15, %14 : vector<16x16xf32>
    %17 = tpu.reciprocal %16 {approx = true} : vector<16x16xf32> -> vector<16x16xf32>
    %c0_15 = arith.constant 0 : index
    %c0_16 = arith.constant 0 : index
    %c0_17 = arith.constant 0 : index
    %18 = vector.load %arg5[%c0_15, %c0_16, %c0_17] : memref<1x16x16xf32, #tpu.memory_space<vmem>>, vector<1x16x16xf32>
    %19 = vector.shape_cast %18 : vector<1x16x16xf32> to vector<16x16xf32>
    %cst_18 = arith.constant 0.000000e+00 : f32
    %20 = vector.broadcast %cst_18 : f32 to vector<16x16xf32>
    %21 = arith.cmpf ogt, %19, %20 : vector<16x16xf32>
    %22 = vector.extract_strided_slice %5 {offsets = [0, 0], sizes = [16, 8], strides = [1, 1]} : vector<16x64xf32> to vector<16x8xf32>
    %23 = vector.extract_strided_slice %8 {offsets = [0, 0], sizes = [16, 8], strides = [1, 1]} : vector<16x64xf32> to vector<16x8xf32>
    %24 = vector.extract_strided_slice %9 {offsets = [0, 0], sizes = [16, 8], strides = [1, 1]} : vector<16x64xf32> to vector<16x8xf32>
    %cst_19 = arith.constant dense<0.000000e+00> : vector<16x16xf32>
    %25 = tpu.matmul %22, %23, %cst_19 {dimension_numbers = #tpu.dot_dimension_numbers<[1], [1], [0], [0], [0, 0, 1, 0], [], []>} : vector<16x8xf32>, vector<16x8xf32>, vector<16x16xf32> -> vector<16x16xf32>
    %26 = arith.mulf %25, %17 : vector<16x16xf32>
    %cst_20 = arith.constant -1.000000e+09 : f32
    %27 = vector.broadcast %cst_20 : f32 to vector<16x16xf32>
    %28 = arith.select %21, %26, %27 : vector<16x16xi1>, vector<16x16xf32>
    %cst_21 = arith.constant dense<0xFF800000> : vector<16xf32>
    %29 = vector.multi_reduction <maximumf>, %28, %cst_21 [1] : vector<16x16xf32> to vector<16xf32>
    %30 = vector.shape_cast %29 : vector<16xf32> to vector<16x1xf32>
    %31 = vector.broadcast %30 : vector<16x1xf32> to vector<16x16xf32>
    %32 = arith.subf %28, %31 : vector<16x16xf32>
    %33 = math.exp %32 : vector<16x16xf32>
    %cst_22 = arith.constant dense<0.000000e+00> : vector<16xf32>
    %34 = vector.multi_reduction <add>, %33, %cst_22 [1] : vector<16x16xf32> to vector<16xf32>
    %35 = vector.shape_cast %34 : vector<16xf32> to vector<16x1xf32>
    %36 = tpu.reciprocal %35 {approx = true} : vector<16x1xf32> -> vector<16x1xf32>
    %37 = vector.broadcast %36 : vector<16x1xf32> to vector<16x16xf32>
    %38 = arith.mulf %33, %37 : vector<16x16xf32>
    %c0_23 = arith.constant 0 : index
    %c0_24 = arith.constant 0 : index
    %c0_25 = arith.constant 0 : index
    %c0_26 = arith.constant 0 : index
    %39 = vector.load %arg8[%c0_23, %c0_24, %c0_25, %c0_26] : memref<8x1x16x16xf32, #tpu.memory_space<vmem>>, vector<1x1x16x16xf32>
    %40 = vector.shape_cast %39 : vector<1x1x16x16xf32> to vector<16x16xf32>
    %41 = vector.shape_cast %38 : vector<16x16xf32> to vector<1x1x16x16xf32>
    tpu.vector_store %arg8[%c0_23, %c0_24, %c0_25, %c0_26], %41 {strides = array<i32>} : memref<8x1x16x16xf32, #tpu.memory_space<vmem>>, vector<1x1x16x16xf32>,
    %cst_27 = arith.constant dense<0.000000e+00> : vector<16x8xf32>
    %42 = tpu.matmul %38, %24, %cst_27 {dimension_numbers = #tpu.dot_dimension_numbers<[1], [0], [0], [1], [0, 0, 1, 1], [], []>} : vector<16x16xf32>, vector<16x8xf32>, vector<16x8xf32> -> vector<16x8xf32>
    %43 = vector.extract_strided_slice %5 {offsets = [0, 8], sizes = [16, 8], strides = [1, 1]} : vector<16x64xf32> to vector<16x8xf32>
    %44 = vector.extract_strided_slice %8 {offsets = [0, 8], sizes = [16, 8], strides = [1, 1]} : vector<16x64xf32> to vector<16x8xf32>
    %45 = vector.extract_strided_slice %9 {offsets = [0, 8], sizes = [16, 8], strides = [1, 1]} : vector<16x64xf32> to vector<16x8xf32>
    %cst_28 = arith.constant dense<0.000000e+00> : vector<16x16xf32>
    %46 = tpu.matmul %43, %44, %cst_28 {dimension_numbers = #tpu.dot_dimension_numbers<[1], [1], [0], [0], [0, 0, 1, 0], [], []>} : vector<16x8xf32>, vector<16x8xf32>, vector<16x16xf32> -> vector<16x16xf32>
    %47 = arith.mulf %46, %17 : vector<16x16xf32>
    %cst_29 = arith.constant -1.000000e+09 : f32
    %48 = vector.broadcast %cst_29 : f32 to vector<16x16xf32>
    %49 = arith.select %21, %47, %48 : vector<16x16xi1>, vector<16x16xf32>
    %cst_30 = arith.constant dense<0xFF800000> : vector<16xf32>
    %50 = vector.multi_reduction <maximumf>, %49, %cst_30 [1] : vector<16x16xf32> to vector<16xf32>
    %51 = vector.shape_cast %50 : vector<16xf32> to vector<16x1xf32>
    %52 = vector.broadcast %51 : vector<16x1xf32> to vector<16x16xf32>
    %53 = arith.subf %49, %52 : vector<16x16xf32>
    %54 = math.exp %53 : vector<16x16xf32>
    %cst_31 = arith.constant dense<0.000000e+00> : vector<16xf32>
    %55 = vector.multi_reduction <add>, %54, %cst_31 [1] : vector<16x16xf32> to vector<16xf32>
    %56 = vector.shape_cast %55 : vector<16xf32> to vector<16x1xf32>
    %57 = tpu.reciprocal %56 {approx = true} : vector<16x1xf32> -> vector<16x1xf32>
    %58 = vector.broadcast %57 : vector<16x1xf32> to vector<16x16xf32>
    %59 = arith.mulf %54, %58 : vector<16x16xf32>
    %c1 = arith.constant 1 : index
    %c0_32 = arith.constant 0 : index
    %c0_33 = arith.constant 0 : index
    %c0_34 = arith.constant 0 : index
    %60 = vector.load %arg8[%c1, %c0_32, %c0_33, %c0_34] : memref<8x1x16x16xf32, #tpu.memory_space<vmem>>, vector<1x1x16x16xf32>
    %61 = vector.shape_cast %60 : vector<1x1x16x16xf32> to vector<16x16xf32>
    %62 = vector.shape_cast %59 : vector<16x16xf32> to vector<1x1x16x16xf32>
    tpu.vector_store %arg8[%c1, %c0_32, %c0_33, %c0_34], %62 {strides = array<i32>} : memref<8x1x16x16xf32, #tpu.memory_space<vmem>>, vector<1x1x16x16xf32>,
    %cst_35 = arith.constant dense<0.000000e+00> : vector<16x8xf32>
    %63 = tpu.matmul %59, %45, %cst_35 {dimension_numbers = #tpu.dot_dimension_numbers<[1], [0], [0], [1], [0, 0, 1, 1], [], []>} : vector<16x16xf32>, vector<16x8xf32>, vector<16x8xf32> -> vector<16x8xf32>
    %64 = vector.extract_strided_slice %5 {offsets = [0, 16], sizes = [16, 8], strides = [1, 1]} : vector<16x64xf32> to vector<16x8xf32>
    %65 = vector.extract_strided_slice %8 {offsets = [0, 16], sizes = [16, 8], strides = [1, 1]} : vector<16x64xf32> to vector<16x8xf32>
    %66 = vector.extract_strided_slice %9 {offsets = [0, 16], sizes = [16, 8], strides = [1, 1]} : vector<16x64xf32> to vector<16x8xf32>
    %cst_36 = arith.constant dense<0.000000e+00> : vector<16x16xf32>
    %67 = tpu.matmul %64, %65, %cst_36 {dimension_numbers = #tpu.dot_dimension_numbers<[1], [1], [0], [0], [0, 0, 1, 0], [], []>} : vector<16x8xf32>, vector<16x8xf32>, vector<16x16xf32> -> vector<16x16xf32>
    %68 = arith.mulf %67, %17 : vector<16x16xf32>
    %cst_37 = arith.constant -1.000000e+09 : f32
    %69 = vector.broadcast %cst_37 : f32 to vector<16x16xf32>
    %70 = arith.select %21, %68, %69 : vector<16x16xi1>, vector<16x16xf32>
    %cst_38 = arith.constant dense<0xFF800000> : vector<16xf32>
    %71 = vector.multi_reduction <maximumf>, %70, %cst_38 [1] : vector<16x16xf32> to vector<16xf32>
    %72 = vector.shape_cast %71 : vector<16xf32> to vector<16x1xf32>
    %73 = vector.broadcast %72 : vector<16x1xf32> to vector<16x16xf32>
    %74 = arith.subf %70, %73 : vector<16x16xf32>
    %75 = math.exp %74 : vector<16x16xf32>
    %cst_39 = arith.constant dense<0.000000e+00> : vector<16xf32>
    %76 = vector.multi_reduction <add>, %75, %cst_39 [1] : vector<16x16xf32> to vector<16xf32>
    %77 = vector.shape_cast %76 : vector<16xf32> to vector<16x1xf32>
    %78 = tpu.reciprocal %77 {approx = true} : vector<16x1xf32> -> vector<16x1xf32>
    %79 = vector.broadcast %78 : vector<16x1xf32> to vector<16x16xf32>
    %80 = arith.mulf %75, %79 : vector<16x16xf32>
    %c2 = arith.constant 2 : index
    %c0_40 = arith.constant 0 : index
    %c0_41 = arith.constant 0 : index
    %c0_42 = arith.constant 0 : index
    %81 = vector.load %arg8[%c2, %c0_40, %c0_41, %c0_42] : memref<8x1x16x16xf32, #tpu.memory_space<vmem>>, vector<1x1x16x16xf32>
    %82 = vector.shape_cast %81 : vector<1x1x16x16xf32> to vector<16x16xf32>
    %83 = vector.shape_cast %80 : vector<16x16xf32> to vector<1x1x16x16xf32>
    tpu.vector_store %arg8[%c2, %c0_40, %c0_41, %c0_42], %83 {strides = array<i32>} : memref<8x1x16x16xf32, #tpu.memory_space<vmem>>, vector<1x1x16x16xf32>,
    %cst_43 = arith.constant dense<0.000000e+00> : vector<16x8xf32>
    %84 = tpu.matmul %80, %66, %cst_43 {dimension_numbers = #tpu.dot_dimension_numbers<[1], [0], [0], [1], [0, 0, 1, 1], [], []>} : vector<16x16xf32>, vector<16x8xf32>, vector<16x8xf32> -> vector<16x8xf32>
    %85 = vector.extract_strided_slice %5 {offsets = [0, 24], sizes = [16, 8], strides = [1, 1]} : vector<16x64xf32> to vector<16x8xf32>
    %86 = vector.extract_strided_slice %8 {offsets = [0, 24], sizes = [16, 8], strides = [1, 1]} : vector<16x64xf32> to vector<16x8xf32>
    %87 = vector.extract_strided_slice %9 {offsets = [0, 24], sizes = [16, 8], strides = [1, 1]} : vector<16x64xf32> to vector<16x8xf32>
    %cst_44 = arith.constant dense<0.000000e+00> : vector<16x16xf32>
    %88 = tpu.matmul %85, %86, %cst_44 {dimension_numbers = #tpu.dot_dimension_numbers<[1], [1], [0], [0], [0, 0, 1, 0], [], []>} : vector<16x8xf32>, vector<16x8xf32>, vector<16x16xf32> -> vector<16x16xf32>
    %89 = arith.mulf %88, %17 : vector<16x16xf32>
    %cst_45 = arith.constant -1.000000e+09 : f32
    %90 = vector.broadcast %cst_45 : f32 to vector<16x16xf32>
    %91 = arith.select %21, %89, %90 : vector<16x16xi1>, vector<16x16xf32>
    %cst_46 = arith.constant dense<0xFF800000> : vector<16xf32>
    %92 = vector.multi_reduction <maximumf>, %91, %cst_46 [1] : vector<16x16xf32> to vector<16xf32>
    %93 = vector.shape_cast %92 : vector<16xf32> to vector<16x1xf32>
    %94 = vector.broadcast %93 : vector<16x1xf32> to vector<16x16xf32>
    %95 = arith.subf %91, %94 : vector<16x16xf32>
    %96 = math.exp %95 : vector<16x16xf32>
    %cst_47 = arith.constant dense<0.000000e+00> : vector<16xf32>
    %97 = vector.multi_reduction <add>, %96, %cst_47 [1] : vector<16x16xf32> to vector<16xf32>
    %98 = vector.shape_cast %97 : vector<16xf32> to vector<16x1xf32>
    %99 = tpu.reciprocal %98 {approx = true} : vector<16x1xf32> -> vector<16x1xf32>
    %100 = vector.broadcast %99 : vector<16x1xf32> to vector<16x16xf32>
    %101 = arith.mulf %96, %100 : vector<16x16xf32>
    %c3 = arith.constant 3 : index
    %c0_48 = arith.constant 0 : index
    %c0_49 = arith.constant 0 : index
    %c0_50 = arith.constant 0 : index
    %102 = vector.load %arg8[%c3, %c0_48, %c0_49, %c0_50] : memref<8x1x16x16xf32, #tpu.memory_space<vmem>>, vector<1x1x16x16xf32>
    %103 = vector.shape_cast %102 : vector<1x1x16x16xf32> to vector<16x16xf32>
    %104 = vector.shape_cast %101 : vector<16x16xf32> to vector<1x1x16x16xf32>
    tpu.vector_store %arg8[%c3, %c0_48, %c0_49, %c0_50], %104 {strides = array<i32>} : memref<8x1x16x16xf32, #tpu.memory_space<vmem>>, vector<1x1x16x16xf32>,
    %cst_51 = arith.constant dense<0.000000e+00> : vector<16x8xf32>
    %105 = tpu.matmul %101, %87, %cst_51 {dimension_numbers = #tpu.dot_dimension_numbers<[1], [0], [0], [1], [0, 0, 1, 1], [], []>} : vector<16x16xf32>, vector<16x8xf32>, vector<16x8xf32> -> vector<16x8xf32>
    %106 = vector.extract_strided_slice %5 {offsets = [0, 32], sizes = [16, 8], strides = [1, 1]} : vector<16x64xf32> to vector<16x8xf32>
    %107 = vector.extract_strided_slice %8 {offsets = [0, 32], sizes = [16, 8], strides = [1, 1]} : vector<16x64xf32> to vector<16x8xf32>
    %108 = vector.extract_strided_slice %9 {offsets = [0, 32], sizes = [16, 8], strides = [1, 1]} : vector<16x64xf32> to vector<16x8xf32>
    %cst_52 = arith.constant dense<0.000000e+00> : vector<16x16xf32>
    %109 = tpu.matmul %106, %107, %cst_52 {dimension_numbers = #tpu.dot_dimension_numbers<[1], [1], [0], [0], [0, 0, 1, 0], [], []>} : vector<16x8xf32>, vector<16x8xf32>, vector<16x16xf32> -> vector<16x16xf32>
    %110 = arith.mulf %109, %17 : vector<16x16xf32>
    %cst_53 = arith.constant -1.000000e+09 : f32
    %111 = vector.broadcast %cst_53 : f32 to vector<16x16xf32>
    %112 = arith.select %21, %110, %111 : vector<16x16xi1>, vector<16x16xf32>
    %cst_54 = arith.constant dense<0xFF800000> : vector<16xf32>
    %113 = vector.multi_reduction <maximumf>, %112, %cst_54 [1] : vector<16x16xf32> to vector<16xf32>
    %114 = vector.shape_cast %113 : vector<16xf32> to vector<16x1xf32>
    %115 = vector.broadcast %114 : vector<16x1xf32> to vector<16x16xf32>
    %116 = arith.subf %112, %115 : vector<16x16xf32>
    %117 = math.exp %116 : vector<16x16xf32>
    %cst_55 = arith.constant dense<0.000000e+00> : vector<16xf32>
    %118 = vector.multi_reduction <add>, %117, %cst_55 [1] : vector<16x16xf32> to vector<16xf32>
    %119 = vector.shape_cast %118 : vector<16xf32> to vector<16x1xf32>
    %120 = tpu.reciprocal %119 {approx = true} : vector<16x1xf32> -> vector<16x1xf32>
    %121 = vector.broadcast %120 : vector<16x1xf32> to vector<16x16xf32>
    %122 = arith.mulf %117, %121 : vector<16x16xf32>
    %c4 = arith.constant 4 : index
    %c0_56 = arith.constant 0 : index
    %c0_57 = arith.constant 0 : index
    %c0_58 = arith.constant 0 : index
    %123 = vector.load %arg8[%c4, %c0_56, %c0_57, %c0_58] : memref<8x1x16x16xf32, #tpu.memory_space<vmem>>, vector<1x1x16x16xf32>
    %124 = vector.shape_cast %123 : vector<1x1x16x16xf32> to vector<16x16xf32>
    %125 = vector.shape_cast %122 : vector<16x16xf32> to vector<1x1x16x16xf32>
    tpu.vector_store %arg8[%c4, %c0_56, %c0_57, %c0_58], %125 {strides = array<i32>} : memref<8x1x16x16xf32, #tpu.memory_space<vmem>>, vector<1x1x16x16xf32>,
    %cst_59 = arith.constant dense<0.000000e+00> : vector<16x8xf32>
    %126 = tpu.matmul %122, %108, %cst_59 {dimension_numbers = #tpu.dot_dimension_numbers<[1], [0], [0], [1], [0, 0, 1, 1], [], []>} : vector<16x16xf32>, vector<16x8xf32>, vector<16x8xf32> -> vector<16x8xf32>
    %127 = vector.extract_strided_slice %5 {offsets = [0, 40], sizes = [16, 8], strides = [1, 1]} : vector<16x64xf32> to vector<16x8xf32>
    %128 = vector.extract_strided_slice %8 {offsets = [0, 40], sizes = [16, 8], strides = [1, 1]} : vector<16x64xf32> to vector<16x8xf32>
    %129 = vector.extract_strided_slice %9 {offsets = [0, 40], sizes = [16, 8], strides = [1, 1]} : vector<16x64xf32> to vector<16x8xf32>
    %cst_60 = arith.constant dense<0.000000e+00> : vector<16x16xf32>
    %130 = tpu.matmul %127, %128, %cst_60 {dimension_numbers = #tpu.dot_dimension_numbers<[1], [1], [0], [0], [0, 0, 1, 0], [], []>} : vector<16x8xf32>, vector<16x8xf32>, vector<16x16xf32> -> vector<16x16xf32>
    %131 = arith.mulf %130, %17 : vector<16x16xf32>
    %cst_61 = arith.constant -1.000000e+09 : f32
    %132 = vector.broadcast %cst_61 : f32 to vector<16x16xf32>
    %133 = arith.select %21, %131, %132 : vector<16x16xi1>, vector<16x16xf32>
    %cst_62 = arith.constant dense<0xFF800000> : vector<16xf32>
    %134 = vector.multi_reduction <maximumf>, %133, %cst_62 [1] : vector<16x16xf32> to vector<16xf32>
    %135 = vector.shape_cast %134 : vector<16xf32> to vector<16x1xf32>
    %136 = vector.broadcast %135 : vector<16x1xf32> to vector<16x16xf32>
    %137 = arith.subf %133, %136 : vector<16x16xf32>
    %138 = math.exp %137 : vector<16x16xf32>
    %cst_63 = arith.constant dense<0.000000e+00> : vector<16xf32>
    %139 = vector.multi_reduction <add>, %138, %cst_63 [1] : vector<16x16xf32> to vector<16xf32>
    %140 = vector.shape_cast %139 : vector<16xf32> to vector<16x1xf32>
    %141 = tpu.reciprocal %140 {approx = true} : vector<16x1xf32> -> vector<16x1xf32>
    %142 = vector.broadcast %141 : vector<16x1xf32> to vector<16x16xf32>
    %143 = arith.mulf %138, %142 : vector<16x16xf32>
    %c5 = arith.constant 5 : index
    %c0_64 = arith.constant 0 : index
    %c0_65 = arith.constant 0 : index
    %c0_66 = arith.constant 0 : index
    %144 = vector.load %arg8[%c5, %c0_64, %c0_65, %c0_66] : memref<8x1x16x16xf32, #tpu.memory_space<vmem>>, vector<1x1x16x16xf32>
    %145 = vector.shape_cast %144 : vector<1x1x16x16xf32> to vector<16x16xf32>
    %146 = vector.shape_cast %143 : vector<16x16xf32> to vector<1x1x16x16xf32>
    tpu.vector_store %arg8[%c5, %c0_64, %c0_65, %c0_66], %146 {strides = array<i32>} : memref<8x1x16x16xf32, #tpu.memory_space<vmem>>, vector<1x1x16x16xf32>,
    %cst_67 = arith.constant dense<0.000000e+00> : vector<16x8xf32>
    %147 = tpu.matmul %143, %129, %cst_67 {dimension_numbers = #tpu.dot_dimension_numbers<[1], [0], [0], [1], [0, 0, 1, 1], [], []>} : vector<16x16xf32>, vector<16x8xf32>, vector<16x8xf32> -> vector<16x8xf32>
    %148 = vector.extract_strided_slice %5 {offsets = [0, 48], sizes = [16, 8], strides = [1, 1]} : vector<16x64xf32> to vector<16x8xf32>
    %149 = vector.extract_strided_slice %8 {offsets = [0, 48], sizes = [16, 8], strides = [1, 1]} : vector<16x64xf32> to vector<16x8xf32>
    %150 = vector.extract_strided_slice %9 {offsets = [0, 48], sizes = [16, 8], strides = [1, 1]} : vector<16x64xf32> to vector<16x8xf32>
    %cst_68 = arith.constant dense<0.000000e+00> : vector<16x16xf32>
    %151 = tpu.matmul %148, %149, %cst_68 {dimension_numbers = #tpu.dot_dimension_numbers<[1], [1], [0], [0], [0, 0, 1, 0], [], []>} : vector<16x8xf32>, vector<16x8xf32>, vector<16x16xf32> -> vector<16x16xf32>
    %152 = arith.mulf %151, %17 : vector<16x16xf32>
    %cst_69 = arith.constant -1.000000e+09 : f32
    %153 = vector.broadcast %cst_69 : f32 to vector<16x16xf32>
    %154 = arith.select %21, %152, %153 : vector<16x16xi1>, vector<16x16xf32>
    %cst_70 = arith.constant dense<0xFF800000> : vector<16xf32>
    %155 = vector.multi_reduction <maximumf>, %154, %cst_70 [1] : vector<16x16xf32> to vector<16xf32>
    %156 = vector.shape_cast %155 : vector<16xf32> to vector<16x1xf32>
    %157 = vector.broadcast %156 : vector<16x1xf32> to vector<16x16xf32>
    %158 = arith.subf %154, %157 : vector<16x16xf32>
    %159 = math.exp %158 : vector<16x16xf32>
    %cst_71 = arith.constant dense<0.000000e+00> : vector<16xf32>
    %160 = vector.multi_reduction <add>, %159, %cst_71 [1] : vector<16x16xf32> to vector<16xf32>
    %161 = vector.shape_cast %160 : vector<16xf32> to vector<16x1xf32>
    %162 = tpu.reciprocal %161 {approx = true} : vector<16x1xf32> -> vector<16x1xf32>
    %163 = vector.broadcast %162 : vector<16x1xf32> to vector<16x16xf32>
    %164 = arith.mulf %159, %163 : vector<16x16xf32>
    %c6 = arith.constant 6 : index
    %c0_72 = arith.constant 0 : index
    %c0_73 = arith.constant 0 : index
    %c0_74 = arith.constant 0 : index
    %165 = vector.load %arg8[%c6, %c0_72, %c0_73, %c0_74] : memref<8x1x16x16xf32, #tpu.memory_space<vmem>>, vector<1x1x16x16xf32>
    %166 = vector.shape_cast %165 : vector<1x1x16x16xf32> to vector<16x16xf32>
    %167 = vector.shape_cast %164 : vector<16x16xf32> to vector<1x1x16x16xf32>
    tpu.vector_store %arg8[%c6, %c0_72, %c0_73, %c0_74], %167 {strides = array<i32>} : memref<8x1x16x16xf32, #tpu.memory_space<vmem>>, vector<1x1x16x16xf32>,
    %cst_75 = arith.constant dense<0.000000e+00> : vector<16x8xf32>
    %168 = tpu.matmul %164, %150, %cst_75 {dimension_numbers = #tpu.dot_dimension_numbers<[1], [0], [0], [1], [0, 0, 1, 1], [], []>} : vector<16x16xf32>, vector<16x8xf32>, vector<16x8xf32> -> vector<16x8xf32>
    %169 = vector.extract_strided_slice %5 {offsets = [0, 56], sizes = [16, 8], strides = [1, 1]} : vector<16x64xf32> to vector<16x8xf32>
    %170 = vector.extract_strided_slice %8 {offsets = [0, 56], sizes = [16, 8], strides = [1, 1]} : vector<16x64xf32> to vector<16x8xf32>
    %171 = vector.extract_strided_slice %9 {offsets = [0, 56], sizes = [16, 8], strides = [1, 1]} : vector<16x64xf32> to vector<16x8xf32>
    %cst_76 = arith.constant dense<0.000000e+00> : vector<16x16xf32>
    %172 = tpu.matmul %169, %170, %cst_76 {dimension_numbers = #tpu.dot_dimension_numbers<[1], [1], [0], [0], [0, 0, 1, 0], [], []>} : vector<16x8xf32>, vector<16x8xf32>, vector<16x16xf32> -> vector<16x16xf32>
    %173 = arith.mulf %172, %17 : vector<16x16xf32>
    %cst_77 = arith.constant -1.000000e+09 : f32
    %174 = vector.broadcast %cst_77 : f32 to vector<16x16xf32>
    %175 = arith.select %21, %173, %174 : vector<16x16xi1>, vector<16x16xf32>
    %cst_78 = arith.constant dense<0xFF800000> : vector<16xf32>
    %176 = vector.multi_reduction <maximumf>, %175, %cst_78 [1] : vector<16x16xf32> to vector<16xf32>
    %177 = vector.shape_cast %176 : vector<16xf32> to vector<16x1xf32>
    %178 = vector.broadcast %177 : vector<16x1xf32> to vector<16x16xf32>
    %179 = arith.subf %175, %178 : vector<16x16xf32>
    %180 = math.exp %179 : vector<16x16xf32>
    %cst_79 = arith.constant dense<0.000000e+00> : vector<16xf32>
    %181 = vector.multi_reduction <add>, %180, %cst_79 [1] : vector<16x16xf32> to vector<16xf32>
    %182 = vector.shape_cast %181 : vector<16xf32> to vector<16x1xf32>
    %183 = tpu.reciprocal %182 {approx = true} : vector<16x1xf32> -> vector<16x1xf32>
    %184 = vector.broadcast %183 : vector<16x1xf32> to vector<16x16xf32>
    %185 = arith.mulf %180, %184 : vector<16x16xf32>
    %c7 = arith.constant 7 : index
    %c0_80 = arith.constant 0 : index
    %c0_81 = arith.constant 0 : index
    %c0_82 = arith.constant 0 : index
    %186 = vector.load %arg8[%c7, %c0_80, %c0_81, %c0_82] : memref<8x1x16x16xf32, #tpu.memory_space<vmem>>, vector<1x1x16x16xf32>
    %187 = vector.shape_cast %186 : vector<1x1x16x16xf32> to vector<16x16xf32>
    %188 = vector.shape_cast %185 : vector<16x16xf32> to vector<1x1x16x16xf32>
    tpu.vector_store %arg8[%c7, %c0_80, %c0_81, %c0_82], %188 {strides = array<i32>} : memref<8x1x16x16xf32, #tpu.memory_space<vmem>>, vector<1x1x16x16xf32>,
    %cst_83 = arith.constant dense<0.000000e+00> : vector<16x8xf32>
    %189 = tpu.matmul %185, %171, %cst_83 {dimension_numbers = #tpu.dot_dimension_numbers<[1], [0], [0], [1], [0, 0, 1, 1], [], []>} : vector<16x16xf32>, vector<16x8xf32>, vector<16x8xf32> -> vector<16x8xf32>
    %190 = tpu.concatenate %42, %63, %84, %105, %126, %147, %168, %189 in 1 : vector<16x8xf32>, vector<16x8xf32>, vector<16x8xf32>, vector<16x8xf32>, vector<16x8xf32>, vector<16x8xf32>, vector<16x8xf32>, vector<16x8xf32> -> vector<16x64xf32>
    %c0_84 = arith.constant 0 : index
    %c0_85 = arith.constant 0 : index
    %c0_86 = arith.constant 0 : index
    %191 = vector.load %arg7[%c0_84, %c0_85, %c0_86] : memref<1x16x64xf32, #tpu.memory_space<vmem>>, vector<1x16x64xf32>
    %192 = vector.shape_cast %191 : vector<1x16x64xf32> to vector<16x64xf32>
    %193 = vector.shape_cast %190 : vector<16x64xf32> to vector<1x16x64xf32>
    tpu.vector_store %arg7[%c0_84, %c0_85, %c0_86], %193 {strides = array<i32>} : memref<1x16x64xf32, #tpu.memory_space<vmem>>, vector<1x16x64xf32>,
    return
  }
  func.func @transform_0(%arg0: i32) -> (i32, i32, i32) {
    %c0_i32 = arith.constant 0 : i32
    %c0_i32_0 = arith.constant 0 : i32
    %c0_i32_1 = arith.constant 0 : i32
    return %arg0, %c0_i32, %c0_i32_0 : i32, i32, i32
  }
  func.func @transform_1(%arg0: i32) -> (i32, i32, i32) {
    %c0_i32 = arith.constant 0 : i32
    %c0_i32_0 = arith.constant 0 : i32
    %c0_i32_1 = arith.constant 0 : i32
    return %arg0, %c0_i32, %c0_i32_0 : i32, i32, i32
  }
  func.func @transform_2(%arg0: i32) -> (i32, i32) {
    %c0_i32 = arith.constant 0 : i32
    %c0_i32_0 = arith.constant 0 : i32
    %c0_i32_1 = arith.constant 0 : i32
    return %c0_i32, %c0_i32_0 : i32, i32
  }
  func.func @transform_3(%arg0: i32) -> (i32, i32) {
    %c0_i32 = arith.constant 0 : i32
    %c0_i32_0 = arith.constant 0 : i32
    %c0_i32_1 = arith.constant 0 : i32
    return %c0_i32, %c0_i32_0 : i32, i32
  }
  func.func @transform_4(%arg0: i32) -> (i32, i32, i32) {
    %c0_i32 = arith.constant 0 : i32
    %c0_i32_0 = arith.constant 0 : i32
    %c0_i32_1 = arith.constant 0 : i32
    return %arg0, %c0_i32, %c0_i32_0 : i32, i32, i32
  }
  func.func @transform_5(%arg0: i32) -> (i32, i32, i32) {
    %c0_i32 = arith.constant 0 : i32
    %c0_i32_0 = arith.constant 0 : i32
    %c0_i32_1 = arith.constant 0 : i32
    return %arg0, %c0_i32, %c0_i32_0 : i32, i32, i32
  }
  func.func @transform_6(%arg0: i32) -> (i32, i32, i32) {
    %c0_i32 = arith.constant 0 : i32
    %c0_i32_0 = arith.constant 0 : i32
    %c0_i32_1 = arith.constant 0 : i32
    return %arg0, %c0_i32, %c0_i32_0 : i32, i32, i32
  }
  func.func @transform_7(%arg0: i32) -> (i32, i32, i32, i32) {
    %c0_i32 = arith.constant 0 : i32
    %c0_i32_0 = arith.constant 0 : i32
    %c0_i32_1 = arith.constant 0 : i32
    %c0_i32_2 = arith.constant 0 : i32
    return %c0_i32, %arg0, %c0_i32_0, %c0_i32_1 : i32, i32, i32, i32
  }
}

</mosaic_0001>

<bundles_post_ra>
// kernel: tpu_custom_call.1
= control target key start
LH: loop header
LB: loop body
LE: loop exit
PB: predicated region body
PF: predicated region fallthrough
CT: control target
= control target key end

     0   :  { %s4408_s0 = inlined_call_operand.hbm [shape: f32[2,16,64], index: 0, kind: input, shape index: {}]   ;;  %s4409_s1 = inlined_call_operand.hbm [shape: f32[2,16,64], index: 1, kind: input, shape index: {}]   ;;  %s4410_s2 = inlined_call_operand.hbm [shape: f32[64,64], index: 2, kind: input, shape index: {}]   ;;  %s4411_s3 = inlined_call_operand.hbm [shape: f32[64,128], index: 3, kind: input, shape index: {}]   ;;  %s4412_s4 = inlined_call_operand.hbm [shape: f32[2,16,16], index: 4, kind: input, shape index: {}]   ;;  %s4413_s5 = inlined_call_operand.hbm [shape: f32[2,16,16], index: 5, kind: input, shape index: {}]   ;;  %s4414_s6 = inlined_call_operand.hbm [shape: f32[2,16,64], index: 6, kind: output, shape index: {0}]   ;;  %s4415_s7 = inlined_call_operand.hbm [shape: f32[8,2,16,16], index: 7, kind: output, shape index: {1}]  }
   0x1   :  { %4437 = sst [smem:[#allocation30_spill]] %s4408_s0 }
   0x2   :  { %4438 = sst [smem:[#allocation31_spill]] %s4410_s2 }
   0x3   :  { %4439 = sst [smem:[#allocation32_spill]] %s4414_s6 }
   0x4   :  { %4440 = sst [smem:[#allocation33_spill]] %s4415_s7 }
   0x5   :  { %13 = vsyncpa [#allocation3], 0 }
   0x6   :  { %15 = vsyncpa [#allocation3 + $0x1], 0 }
   0x7   :  { %16 = vsyncpa [#allocation6], 0 }
   0x8   :  { %18 = vsyncpa [#allocation6 + $0x1], 0 }
   0x9   :  { %19 = vsyncpa [#allocation9], 0 }
   0xa   :  { %20 = vsyncpa [#allocation4], 0 }
   0xb   :  { %22 = vsyncpa [#allocation4 + $0x1], 0 }
   0xc   :  { %23 = vsyncpa [#allocation14], 0 }
   0xd   :  { %25 = vsyncpa [#allocation14 + $0x1], 0  ;;  %s3688_s24 = smov 0   ;;  %s3690_s25 = smov 0  }
   0xe   :  { %s3692_s26 = smov 0   ;;  %s3694_s27 = smov 0  }
   0xf LB: > { %4441 = sst [smem:[#allocation25_spill]] %s3602_s24  ;;  %s3709_s28 = sadd.s32 4294967295, %s3614_s27   ;;  %s3614_s27 = sphi %s3694_s27, %s4482_s27   ;;  %s3610_s26 = sphi %s3692_s26, %s4484_s26   ;;  %s3606_s25 = sphi %s3690_s25, %s4486_s25   ;;  %s3602_s24 = sphi %s3688_s24, %s4485_s24  }
  0x10   : > { %4442 = sst [smem:[#allocation26_spill]] %s3610_s26  ;;  %s2631_s29 = sadd.s32 4294967294, %s3614_s27  }
  0x11   : > { %s3713_s30 = sadd.s32 1, %s3614_s27   ;;  %s38_s8 = sadd.s32 1, %s3610_s26 }
  0x12   : > { %4443 = sst [smem:[#allocation27_spill]] %s3713_s30  ;;  %s35_s9 = ssub.s32 %s3614_s27, %s3713_s30 }
  0x13   : > { %p45_p0 = scmp.ne.s32.totalorder %s3610_s26, %s3606_s25  ;;  %p36_p1 = scmp.eq.s32.totalorder %s35_s9, 0 }
  0x14   : > { %p46_p2 = scmp.eq.s32.totalorder %s3614_s27, 0  ;;  %p51_p3 = scmp.ne.s32.totalorder %s3606_s25, %s3602_s24 }
  0x15   : > { %p4416_p4 = scmp.eq.s32.totalorder %s3709_s28, 0  ;;  %p195_p7 = scmp.eq.s32.totalorder %s3709_s28, 1 }
  0x16   : > { %s3725_s10 = scalar_select %p36_p1, %s3610_s26, %s38_s8  }
  0x17   : > { %p3727_p5 = por %p46_p2, %p45_p0  ;;  %p3733_p6 = por %p4416_p4, %p51_p3 }
  0x18   : > { %4444 = sst [smem:[#allocation28_spill]] %s3725_s10  ;;  %p201_p8 = scmp.eq.s32.totalorder %s2631_s29, 1 }
  0x19   : > { %s4445_s11 = scalar_select %p3727_p5, 1, 0 }
  0x1a   : > { %s4446_s12 = scalar_select %p3733_p6, 1, 0 }
  0x1b   : > { %p2632_p9 = scmp.ge.s32.totalorder %s3614_s27, 1  ;;  %p234_p10 = scmp.lt.s32.totalorder %s3614_s27, 3 }
  0x1c   : > { %p3740_p11 = por %p195_p7, %p45_p0  ;;  %p3744_p12 = por %p201_p8, %p51_p3 }
  0x1d   : > { %p3748_p13 = pnand %p2632_p9, %p234_p10  ;;  %s3616_s16 = smov [#allocation7]  }
  0x1e   : > { %s4447_s13 = scalar_select %p3740_p11, 1, 0 }
  0x1f   : > { %s4448_s14 = scalar_select %p3744_p12, 1, 0 }
  0x20   : > { %s4450_s15 = scalar_select %p3748_p13, 1, 0 }
  0x21   : > { %4449 = sst [smem:[#allocation29_spill]] %s4448_s14  ;;  %p3109_p1 = pneg %p3748_p13 }
  0x22   : > { %s246_s17 = sshll.u32 %s3616_s16, 4  ;;  %s4452_s2 = sld [smem:[#allocation31_spill]]  ;;  %s247_s17 = int_to_ptr.vmem [resolvable:$true] %s246_s17 }
  0x23   : > { %p3756_p2 = pnand %p3109_p1, %p4416_p4 }
  0x25   : > { %s4451_s18 = scalar_select %p3756_p2, 1, 0 }
  0x26   : > { %p4425_p8 = pneg %p3756_p2 }
  0x28   : > { %s3348_s22 = scalar_lea.hbm %s4452_s2, 1024 }
  0x29   : > { %p3349_p7 = scmp.ne.s32.totalorder %s4452_s2, %s3348_s22  ;;  %p3355_p1 = scmp.lt.u32.totalorder %s3348_s22, %s4452_s2 }
  0x2b   : > { %p3351_p9 = pnand %p4425_p8, %p3349_p7 }
  0x2d   : > { %p3352_p10 = pneg %p3351_p9 }
  0x2f   : > { %p3357_p0 = pnand %p3355_p1, %p3352_p10 }
  0x31   : > { %3360 = shalt.err (!%p3357_p0)
}
  0x32   : > { %s3361_s16 = scalar_lea.vmem %s247_s17, 1024  ;;  %p3369_p11 = scmp.lt.s32.totalorder %s247_s17, %s247_s17 }
  0x33   : > { %p3362_p4 = scmp.ne.s32.totalorder %s247_s17, %s3361_s16  ;;  %p3370_p6 = scmp.lt.s32.totalorder %s3361_s16, %s3361_s16 }
  0x35   : > { %p3364_p3 = pnand %p3362_p4, %p4425_p8  ;;  %p3371_p13 = por %p3370_p6, %p3369_p11 }
  0x37   : > { %p3365_p12 = pneg %p3364_p3 }
  0x39   : > { %p3372_p5 = pnand %p3371_p13, %p3365_p12 }
  0x3b   : > { %3375 = shalt.err (!%p3372_p5)
}
  0x3c   : > { %s4420_s20 = smov 128   ;;  %s4422_s21 = smov 8  }
  0x3d   : > { %3112 = dma.hbm_to_vmem [thread:$0]  (!%p3756_p2), %s4452_s2, 1024, %s247_s17, [#allocation6], %s4420_s20, %s4420_s20, %s4422_s21  }
  0x3e   : > { %s275_s29 = sand.u32 1, %s3610_s26   ;;  %s3790_s8 = sshll.u32 %s3614_s27, 8 }
  0x3f   : > { %s3792_s9 = sshll.u32 %s275_s29, 4  ;;  %s4453_s0 = sld [smem:[#allocation30_spill]] }
  0x40   : > { %p4454_p4 = scmp.ne.s32.totalorder %s4445_s11, 0  ;;  %p4455_p5 = scmp.lt.s32.totalorder %s3614_s27, 2 }
  0x41   : > { %s277_s22 = scalar_lea.vmem [#allocation2], %s3792_s9  ;;  %s4457_s29 = sand.u32 1, %s3614_s27  }
  0x42   : > { %p3804_p6 = pnand %p4455_p5, %p4454_p4  ;;  %s284_s23 = sshll.u32 %s277_s22, 4  ;;  %s3809_s23 = int_to_ptr.vmem [resolvable:$true] %s284_s23 }
  0x43   : > { %s3813_s19 = scalar_lea.sflag [#allocation3], %s4457_s29 }
  0x44   : > { %s4456_s17 = scalar_select %p3804_p6, 1, 0 }
  0x45   : > { %s3798_s10 = scalar_lea.hbm %s4453_s0, %s3790_s8  ;;  %p3819_p12 = pneg %p3804_p6 }
  0x46   : > { %s3376_s16 = scalar_lea.hbm %s3798_s10, 256  ;;  %s3381_s22 = scalar_lea.hbm %s4453_s0, 512 }
  0x47   : > { %p3377_p11 = scmp.ne.s32.totalorder %s3798_s10, %s3376_s16  ;;  %p3382_p3 = scmp.lt.u32.totalorder %s3798_s10, %s4453_s0 }
  0x48   : > { %s4458_s11 = scalar_select %p3819_p12, 1, 0 }
  0x49   : > { %p3379_p13 = pnand %p3819_p12, %p3377_p11  ;;  %p3383_p7 = scmp.lt.u32.totalorder %s3381_s22, %s3376_s16 }
  0x4a   : > { %p3385_p10 = scmp.lt.u32.totalorder %s3376_s16, %s3798_s10 }
  0x4b   : > { %p3380_p0 = pneg %p3379_p13  ;;  %p3384_p9 = por %p3383_p7, %p3382_p3 }
  0x4d   : > { %p3386_p1 = por %p3385_p10, %p3384_p9 }
  0x4f   : > { %p3387_p4 = pnand %p3386_p1, %p3380_p0 }
  0x51   : > { %3390 = shalt.err (!%p3387_p4)
}
  0x52   : > { %s3391_s29 = scalar_lea.vmem %s3809_s23, 256  ;;  %s3619_s20 = smov [#allocation2]  }
  0x53   : > { %p3392_p5 = scmp.ne.s32.totalorder %s3809_s23, %s3391_s29  ;;  %s3396_s21 = sshll.u32 %s3619_s20, 4  ;;  %s3397_s21 = int_to_ptr.vmem [resolvable:$false] %s3396_s21 }
  0x54   : > { %s3398_s2 = scalar_lea.vmem %s3397_s21, 512  ;;  %p3399_p8 = scmp.lt.s32.totalorder %s3809_s23, %s3397_s21 }
  0x55   : > { %p3394_p11 = pnand %p3392_p5, %p3819_p12  ;;  %p3400_p2 = scmp.lt.s32.totalorder %s3398_s2, %s3391_s29 }
  0x57   : > { %p3395_p13 = pneg %p3394_p11  ;;  %p3401_p3 = por %p3400_p2, %p3399_p8 }
  0x59   : > { %p3402_p7 = pnand %p3401_p3, %p3395_p13 }
  0x5b   : > { %3405 = shalt.err (!%p3402_p7)
}
  0x5c   : > { %s4459_s26 = smov 8   ;;  %s4460_s16 = smov 128  }
  0x5d   : > { %3119 = dma.hbm_to_vmem [thread:$0]  (!%p3804_p6), %s3798_s10, 256, %s3809_s23, %s3813_s19, %s4460_s16, %s4460_s16, %s4459_s26  }
  0x5e   : > { %s3850_s29 = scalar_lea.hbm %s4409_s1, %s3790_s8  ;;  %s298_s21 = scalar_lea.vmem [#allocation5], %s3792_s9 }
  0x5f   : > { %s305_s2 = sshll.u32 %s298_s21, 4  ;;  %s3620_s0 = smov [#allocation8]   ;;  %s3853_s2 = int_to_ptr.vmem [resolvable:$true] %s305_s2 }
  0x60   : > { %s3855_s30 = sshll.u32 %s3620_s0, 4  ;;  %s4461_s14 = sand.u32 1, %s3614_s27   ;;  %s260_s30 = int_to_ptr.vmem [resolvable:$true] %s3855_s30 }
  0x61   : > { %s3859_s24 = scalar_lea.sflag [#allocation6], %s4461_s14  ;;  %s3406_s10 = scalar_lea.hbm %s3850_s29, 256 }
  0x62   : > { %p3407_p2 = scmp.ne.s32.totalorder %s3850_s29, %s3406_s10  ;;  %s3411_s20 = scalar_lea.hbm %s4409_s1, 512 }
  0x63   : > { %p3412_p9 = scmp.lt.u32.totalorder %s3850_s29, %s4409_s1  ;;  %p3413_p10 = scmp.lt.u32.totalorder %s3411_s20, %s3406_s10 }
  0x64   : > { %p3409_p8 = pnand %p3407_p2, %p3819_p12  ;;  %p3415_p4 = scmp.lt.u32.totalorder %s3406_s10, %s3850_s29 }
  0x65   : > { %p3414_p1 = por %p3413_p10, %p3412_p9 }
  0x66   : > { %p3410_p0 = pneg %p3409_p8 }
  0x67   : > { %p3416_p5 = por %p3415_p4, %p3414_p1 }
  0x69   : > { %p3417_p11 = pnand %p3416_p5, %p3410_p0 }
  0x6b   : > { %3420 = shalt.err (!%p3417_p11)
}
  0x6c   : > { %s3421_s0 = scalar_lea.vmem %s3853_s2, 256  ;;  %s3621_s14 = smov [#allocation5]  }
  0x6d   : > { %p3422_p13 = scmp.ne.s32.totalorder %s3853_s2, %s3421_s0  ;;  %s3426_s21 = sshll.u32 %s3621_s14, 4  ;;  %s3427_s21 = int_to_ptr.vmem [resolvable:$false] %s3426_s21 }
  0x6e   : > { %s3428_s6 = scalar_lea.vmem %s3427_s21, 512  ;;  %p3429_p2 = scmp.lt.s32.totalorder %s3853_s2, %s3427_s21 }
  0x6f   : > { %p3424_p3 = pnand %p3422_p13, %p3819_p12  ;;  %p3430_p8 = scmp.lt.s32.totalorder %s3428_s6, %s3421_s0 }
  0x71   : > { %p3425_p7 = pneg %p3424_p3  ;;  %p3431_p9 = por %p3430_p8, %p3429_p2 }
  0x73   : > { %p3432_p10 = pnand %p3431_p9, %p3425_p7 }
  0x75   : > { %3435 = shalt.err (!%p3432_p10)
}
  0x76   : > { %3122 = dma.hbm_to_vmem [thread:$0]  (!%p3804_p6), %s3850_s29, 256, %s3853_s2, %s3859_s24, %s4460_s16, %s4460_s16, %s4459_s26  }
  0x77   : > { %s3436_s23 = scalar_lea.hbm %s4411_s3, 1024  ;;  %p4462_p1 = scmp.ne.s32.totalorder %s4451_s18, 0 }
  0x78   : > { %p3437_p0 = scmp.ne.s32.totalorder %s4411_s3, %s3436_s23  ;;  %p3443_p13 = scmp.lt.u32.totalorder %s3436_s23, %s4411_s3 }
  0x79   : > { %p4463_p4 = pneg %p4462_p1 }
  0x7b   : > { %p3439_p5 = pnand %p3437_p0, %p4463_p4 }
  0x7d   : > { %p3440_p11 = pneg %p3439_p5 }
  0x7f   : > { %p3445_p3 = pnand %p3443_p13, %p3440_p11 }
  0x81   : > { %3448 = shalt.err (!%p3445_p3)
}
  0x82   : > { %s3449_s29 = scalar_lea.vmem %s260_s30, 1024  ;;  %p4464_p2 = pmov %p4463_p4 }
  0x83   : > { %p3450_p7 = scmp.ne.s32.totalorder %s260_s30, %s3449_s29  ;;  %p3457_p10 = scmp.lt.s32.totalorder %s260_s30, %s260_s30 }
  0x84   : > { %p3458_p6 = scmp.lt.s32.totalorder %s3449_s29, %s3449_s29 }
  0x85   : > { %p3452_p8 = pnand %p3450_p7, %p4464_p2 }
  0x86   : > { %p3459_p12 = por %p3458_p6, %p3457_p10 }
  0x87   : > { %p3453_p9 = pneg %p3452_p8 }
  0x89   : > { %p3460_p0 = pnand %p3459_p12, %p3453_p9 }
  0x8b   : > { %3463 = shalt.err (!%p3460_p0)
}
  0x8c   : > { %3115 = dma.hbm_to_vmem [thread:$0]  (!%p4462_p1), %s4411_s3, 1024, %s260_s30, [#allocation9], %s4460_s16, %s4460_s16, %s4459_s26  }
  0x8d   : > { %s3914_s10 = scalar_lea.hbm %s4412_s4, %s3790_s8  ;;  %s319_s18 = scalar_lea.vmem [#allocation10], %s3792_s9 }
  0x8e   : > { %s326_s23 = sshll.u32 %s319_s18, 4  ;;  %s3464_s22 = scalar_lea.hbm %s3914_s10, 256  ;;  %s3917_s23 = int_to_ptr.vmem [resolvable:$true] %s326_s23 }
  0x8f   : > { %p3465_p6 = scmp.ne.s32.totalorder %s3914_s10, %s3464_s22  ;;  %p4465_p12 = scmp.ne.s32.totalorder %s4458_s11, 0 }
  0x90   : > { %s3469_s0 = scalar_lea.hbm %s4412_s4, 512  ;;  %p3470_p1 = scmp.lt.u32.totalorder %s3914_s10, %s4412_s4 }
  0x91   : > { %p3467_p4 = pnand %p3465_p6, %p4465_p12  ;;  %p3471_p11 = scmp.lt.u32.totalorder %s3469_s0, %s3464_s22 }
  0x92   : > { %p3473_p3 = scmp.lt.u32.totalorder %s3464_s22, %s3914_s10 }
  0x93   : > { %p3468_p5 = pneg %p3467_p4  ;;  %p3472_p13 = por %p3471_p11, %p3470_p1 }
  0x95   : > { %p3474_p7 = por %p3473_p3, %p3472_p13 }
  0x97   : > { %p3475_p2 = pnand %p3474_p7, %p3468_p5 }
  0x99   : > { %3478 = shalt.err (!%p3475_p2)
}
  0x9a   : > { %s3479_s2 = scalar_lea.vmem %s3917_s23, 256  ;;  %s3622_s21 = smov [#allocation10]  }
  0x9b   : > { %p3480_p8 = scmp.ne.s32.totalorder %s3917_s23, %s3479_s2  ;;  %s3484_s6 = sshll.u32 %s3622_s21, 4  ;;  %s3485_s6 = int_to_ptr.vmem [resolvable:$false] %s3484_s6 }
  0x9c   : > { %s3486_s7 = scalar_lea.vmem %s3485_s6, 512  ;;  %p3487_p0 = scmp.lt.s32.totalorder %s3917_s23, %s3485_s6 }
  0x9d   : > { %p3482_p9 = pnand %p3480_p8, %p4465_p12  ;;  %p3488_p6 = scmp.lt.s32.totalorder %s3486_s7, %s3479_s2 }
  0x9f   : > { %p3483_p10 = pneg %p3482_p9  ;;  %p3489_p4 = por %p3488_p6, %p3487_p0 }
  0xa1   : > { %p3490_p1 = pnand %p3489_p4, %p3483_p10 }
  0xa3   : > { %3493 = shalt.err (!%p3490_p1)
}
  0xa4   : > { %p4466_p5 = scmp.ne.s32.totalorder %s4456_s17, 0  ;;  %s3948_s20 = scalar_lea.hbm %s4413_s5, %s3790_s8 }
  0xa5   : > { %s340_s30 = scalar_lea.vmem [#allocation11], %s3792_s9  ;;  %s3494_s14 = scalar_lea.hbm %s3948_s20, 256 }
  0xa6   : > { %3125 = dma.hbm_to_vmem [thread:$0]  (!%p4466_p5), %s3914_s10, 256, %s3917_s23, %s3813_s19, %s4460_s16, %s4460_s16, %s4459_s26  }
  0xa7   : > { %s347_s0 = sshll.u32 %s340_s30, 4  ;;  %p3495_p11 = scmp.ne.s32.totalorder %s3948_s20, %s3494_s14  ;;  %s3951_s0 = int_to_ptr.vmem [resolvable:$true] %s347_s0 }
  0xa8   : > { %s3499_s10 = scalar_lea.hbm %s4413_s5, 512  ;;  %p3500_p7 = scmp.lt.u32.totalorder %s3948_s20, %s4413_s5 }
  0xa9   : > { %p3497_p13 = pnand %p3495_p11, %p4465_p12  ;;  %p3501_p2 = scmp.lt.u32.totalorder %s3499_s10, %s3494_s14 }
  0xaa   : > { %p3503_p9 = scmp.lt.u32.totalorder %s3494_s14, %s3948_s20 }
  0xab   : > { %p3498_p3 = pneg %p3497_p13  ;;  %p3502_p8 = por %p3501_p2, %p3500_p7 }
  0xad   : > { %p3504_p10 = por %p3503_p9, %p3502_p8 }
  0xaf   : > { %p3505_p0 = pnand %p3504_p10, %p3498_p3 }
  0xb1   : > { %3508 = shalt.err (!%p3505_p0)
}
  0xb2   : > { %s3509_s9 = scalar_lea.vmem %s3951_s0, 256  ;;  %s3623_s2 = smov [#allocation11]  }
  0xb3   : > { %p3510_p6 = scmp.ne.s32.totalorder %s3951_s0, %s3509_s9  ;;  %s3514_s21 = sshll.u32 %s3623_s2, 4  ;;  %s3515_s21 = int_to_ptr.vmem [resolvable:$false] %s3514_s21 }
  0xb4   : > { %s3516_s6 = scalar_lea.vmem %s3515_s21, 512  ;;  %p3517_p11 = scmp.lt.s32.totalorder %s3951_s0, %s3515_s21 }
  0xb5   : > { %p3512_p4 = pnand %p3510_p6, %p4465_p12  ;;  %p3518_p13 = scmp.lt.s32.totalorder %s3516_s6, %s3509_s9 }
  0xb7   : > { %p3513_p1 = pneg %p3512_p4  ;;  %p3519_p7 = por %p3518_p13, %p3517_p11 }
  0xb9   : > { %p3520_p2 = pnand %p3519_p7, %p3513_p1 }
  0xbb   : > { %3523 = shalt.err (!%p3520_p2)
}
  0xbc   : > { %3128 = dma.hbm_to_vmem [thread:$0]  (!%p4466_p5), %s3948_s20, 256, %s3951_s0, %s3859_s24, %s4460_s16, %s4460_s16, %s4459_s26  }
  0xbd   : > { %p4467_p12 = scmp.ne.s32.totalorder %s4450_s15, 0 }
  0xbe   : > { %s361_s11 = sand.u32 (!%p4467_p12), 1, %s3709_s28   ;;  %s3982_s7 = sand.u32 (!%p4467_p12), 1, %s3606_s25  }
  0xbf   : > { %359 = sbr.rel (%p4467_p12) target bundleno = 5159 (0x1427), region = 44  ;;  %s3985_s18 = sshll.u32 (!%p4467_p12), %s3982_s7, 4 }
  0xc0   : > { %s362_s17 = scalar_lea.sflag (!%p4467_p12), [#allocation3], %s361_s11  ;;  %s365_s22 = scalar_lea.vmem (!%p4467_p12), [#allocation2], %s3985_s18 }
  0xc1   : > { %p4468_p3 = scmp.ne.s32.totalorder (!%p4467_p12), %s4446_s12, 0 }
  0xc6   : > { %3569 = dma.done.wait (%p4468_p3), %s362_s17, 256  }
  0xc7   : > { %3571 = vsyncadd (%p4468_p3), %s362_s17, 4294967040  ;;  %s371_s24 = scalar_lea.sflag [#allocation6], %s361_s11  ;;  %s374_s15 = scalar_lea.vmem [#allocation5], %s3985_s18 }
  0xc8   : > { %3573 = dma.done.wait (%p4468_p3), %s371_s24, 256  }
  0xc9   : > { %3575 = vsyncadd (%p4468_p3), %s371_s24, 4294967040  ;;  %p4469_p5 = scmp.eq.s32.totalorder %s3709_s28, 0 }
  0xcb   : > { %3577 = dma.done.wait (%p4469_p5), [#allocation6], 1024   ;;  %p4470_p8 = pmov %p4469_p5 }
  0xcc   : > { %p4471_p9 = pmov %p4469_p5 }
  0xcd   : > { %3579 = vsyncadd (%p4470_p8), [#allocation6], 4294966272 }
  0xce   : > { %3581 = dma.done.wait (%p4471_p9), [#allocation9], 1024   ;;  %p4472_p10 = pmov %p4469_p5 }
  0xcf   : > { %s391_s26 = scalar_lea.vmem [#allocation10], %s3985_s18 }
  0xd0   : > { %3583 = vsyncadd (%p4472_p10), [#allocation9], 4294966272 }
  0xd1   : > { %3585 = dma.done.wait (%p4468_p3), %s362_s17, 256  }
  0xd2   : > { %3587 = vsyncadd (%p4468_p3), %s362_s17, 4294967040  ;;  %s400_s16 = scalar_lea.vmem [#allocation11], %s3985_s18 }
  0xd3   : > { %3589 = dma.done.wait (%p4468_p3), %s371_s24, 256  }
  0xd4   : > { %3591 = vsyncadd (%p4468_p3), %s371_s24, 4294967040  ;;  %v545_v0 = vld [vmem:[#allocation8] sm:$0xff]  ;;  %v546_v1 = vld [vmem:[#allocation8 + $0x8] sm:$0xff]  ;;  %vm463_vm0 = vcmask 523264   ;;  %vm650_vm1 = vcmask 64512   ;;  %s3624_s12 = smov 120  }
  0xd5   : > { %v547_v2 = vld [vmem:[#allocation8 + $0x10] sm:$0xff]  ;;  %v2987_v3 = vpack.c.bf16 %v546_v1, %v545_v0  ;;  %v548_v4 = vld [vmem:[#allocation8 + $0x18] sm:$0xff]  ;;  %v455_v5 = vld [vmem:[#allocation7] sm:$0xff]  ;;  %vm742_vm4 = vcmask 130048   ;;  %s3625_s20 = smov 64   ;;  %s2656_s30 = sshll.u32 %s3982_s7, 7 }
  0xd6   : > { %v456_v6 = vld [vmem:[#allocation7 + $0x8] sm:$0xff]  ;;  %v2991_v7 = vpack.c.bf16 %v548_v4, %v547_v2  ;;  %v549_v9 = vld [vmem:[#allocation8 + $0x20] sm:$0xff]  ;;  %v457_v11 = vld [vmem:[#allocation7 + $0x10] sm:$0xff]  ;;  %s4085_s0 = scalar_lea.vmem [#allocation13], %s2656_s30  ;;  %s3626_s14 = smov 112   ;;  %vm2363_vm6 = vcmask 195584  }
  0xd7   : > { %v2971_v8 = vpack.c.bf16 %v456_v6, %v455_v5  ;;  %v550_v10 = vld [vmem:[#allocation8 + $0x28] sm:$0xff]  ;;  %2988 = vmatprep.subr.bf16.mxu1 %v2987_v3  ;;  %v458_v12 = vld [vmem:[#allocation7 + $0x18] sm:$0xff]  ;;  %v453_v14 = vld [vmem:[%s374_s15] sm:$0xff]  ;;  %s3627_s29 = smov 56   ;;  %s3628_s19 = smov 104   ;;  %vm2366_vm7 = vcmask 261120  }
  0xd8   : > { %2990 = vmatpush3.bf16.msra.mxu1 %v2987_v3  ;;  %v2975_v13 = vpack.c.bf16 %v458_v12, %v457_v11  ;;  %v459_v15 = vld [vmem:[#allocation7 + $0x20] sm:$0xff]  ;;  %v460_v16 = vld [vmem:[#allocation7 + $0x28] sm:$0xff]  ;;  %v2995_v17 = vpack.c.bf16 %v550_v10, %v549_v9  ;;  %v551_v18 = vld [vmem:[#allocation8 + $0x30] sm:$0xff]  ;;  %2856 = vmatprep.mubr.msk.f32.mxu1 %vm463_vm0, %v453_v14  ;;  %s3629_s10 = smov 48   ;;  %s3630_s23 = smov 96   ;;  %vm2369_vm8 = vcmask 326656  }
  0xd9   : > { %2972 = vmatprep.subr.bf16.mxu0 %v2971_v8  ;;  %2992 = vmatprep.subr.bf16.mxu1 %v2991_v7  ;;  %v552_v19 = vld [vmem:[#allocation8 + $0x38] sm:$0xff]  ;;  %v2979_v20 = vpack.c.bf16 %v460_v16, %v459_v15  ;;  %v451_v21 = vld [vmem:[%s365_s22] sm:$0xff]  ;;  %vm4029_vm2 = vmpackc.low %vm650_vm1, %vm650_vm1  ;;  %s3631_s8 = smov 40   ;;  %s3632_s9 = smov 88   ;;  %vm2372_vm9 = vcmask 392192   ;;  %vm2375_vm10 = vcmask 457728  }
  0xda   : > { %2974 = vmatpush3.bf16.msra.mxu0 %v2971_v8  ;;  %v461_v22 = vld [vmem:[#allocation7 + $0x30] sm:$0xff]  ;;  %v462_v23 = vld [vmem:[#allocation7 + $0x38] sm:$0xff]  ;;  %2837 = vmatprep.mubr.msk.f32.mxu0 %vm463_vm0, %v451_v21  ;;  %v2999_v24 = vpack.c.bf16 %v552_v19, %v551_v18  ;;  %s3633_s2 = smov 32   ;;  %s3634_s21 = smov 80  }
  0xdb   : > { %2976 = vmatprep.subr.bf16.mxu0 %v2975_v13  ;;  %v2983_v25 = vpack.c.bf16 %v462_v23, %v461_v22  ;;  %v454_v26 = vld [vmem:[%s374_s15 + $0x8] sm:$0xff]  ;;  %v634_v36 = vld [vmem:[%s400_s16] sm:$0xff]  ;;  %s3635_s6 = smov 24   ;;  %s3636_s11 = smov 72  }
  0xdc   : > { %2994 = vmatpush3.bf16.msra.mxu1 %v2991_v7  ;;  %v452_v27 = vld [vmem:[%s365_s22 + $0x8] sm:$0xff]  ;;  %v636_v38 = vsub.f32 0.0, %v634_v36  ;;  %v4059_v46 = vld [vmem:[%s391_s26] sm:$0xff]  ;;  %s3637_s17 = smov 16   ;;  %s3638_s22 = smov 8  }
  0xdd   : > { %2996 = vmatprep.subr.bf16.mxu1 %v2995_v17  ;;  %v635_v35 = vld [vmem:[%s400_s16 + $0x8] sm:$0xff]  ;;  %vm648_vm3 = vcmp.gt.f32.partialorder %v4059_v46, 0.0  ;;  %s443_s24 = scalar_lea.vmem [#allocation12], %s3985_s18  ;;  %s2381_s30 = scalar_lea.sflag [#allocation4], %s3982_s7 }
  0xde   : > { %2978 = vmatpush3.bf16.msra.mxu0 %v2975_v13  ;;  %v637_v37 = vsub.f32 0.0, %v635_v35  ;;  %v638_v40 = vmul.f32 1.442695, %v636_v38  ;;  %v4065_v49 = vld [vmem:[%s391_s26 + $0x8] sm:$0xff]  ;;  %s2399_s15 = sshll.u32 %s443_s24, 4  ;;  %s2735_s26 = sshll.u32 %s3709_s28, 8  ;;  %s4333_s15 = int_to_ptr.vmem [resolvable:$true] %s2399_s15 }
  0xdf   : > { %2980 = vmatprep.subr.bf16.mxu0 %v2979_v20  ;;  %vm649_vm5 = vcmp.gt.f32.partialorder %v4065_v49, 0.0  ;;  %p4476_p6 = scmp.ne.s32.totalorder %s4447_s13, 0 }
  0xe0   : > { %2998 = vmatpush3.bf16.msra.mxu1 %v2995_v17  ;;  %v640_v39 = vmul.f32 1.442695, %v637_v37 }
  0xe1   : > { %3000 = vmatprep.subr.bf16.mxu1 %v2999_v24 }
  0xe2   : > { %2982 = vmatpush3.bf16.msra.mxu0 %v2979_v20  ;;  %3276 = vpow2.f32 %v640_v39 }
  0xe3   : > { %2984 = vmatprep.subr.bf16.mxu0 %v2983_v25  ;;  %3278 = vpow2.f32 %v638_v40 }
  0xe4   : > { %3002 = vmatpush3.bf16.msra.mxu1 %v2999_v24 }
  0xe6   : > { %2986 = vmatpush3.bf16.msra.mxu0 %v2983_v25 }
  0xe7   : > { %2857 = vmatmul.mubr.msk.f32.vlgmr.msra.gmra.mrb[0].mxu1 %vm463_vm0, %v454_v26 }
  0xe9   : > { %2838 = vmatmul.mubr.msk.f32.vlgmr.msra.gmra.mrb[0].mxu0 %vm463_vm0, %v452_v27 }
  0xec   : > { %v3277_v41 = vpop.eup %3276 }
  0xed   : > { %v3279_v42 = vpop.eup %3278  ;;  %v643_v43 = vadd.f32 1.0, %v3277_v41 }
  0xee   : > { %v642_v44 = vadd.f32 1.0, %v3279_v42 }
  0xef   : > { %3280 = vrcp.f32 %v643_v43 }
  0xf0   : > { %3282 = vrcp.f32 %v642_v44 }
  0xf9   : > { %v4055_v45 = vpop.eup %3280 }
  0xfa   : > { %v4061_v47 = vpop.eup %3282 }
 0x1ba   : > { %v2858_v28 = vpop.f32.mrb[0].mxu1 }
 0x1bb   : > { %v625_v29 = vpop.f32.mrb[1].mxu1 }
 0x1bc   : > { %v4033_v31 = vpop.f32.mrb[0].mxu0  ;;  %v4035_v32 = vpack.i.bf16 %v2858_v28, %v625_v29  ;;  %v3003_v33 = vpack.c.bf16 %v2858_v28, %v625_v29 }
 0x1bd   : > { %v4037_v34 = vpop.f32.mrb[1].mxu0 }
 0x1be   : > { %2863 = vmatprep.mubr.msk.f32.mxu0 %vm650_vm1, %v4037_v34  ;;  %3207 = vrot.lane.b32.xlu1 %v4035_v32, %s3624_s12 }
 0x1bf   : > { %3005 = vmatprep.subr.msk.bf16.mxu0 %vm4029_vm2, %v3003_v33 }
 0x1c0   : > { %3008 = vmatpush3.bf16.xpose.msk.msra.mxu0 %vm4029_vm2, %v3003_v33 }
 0x1c2   : > { %854 = vrot.lane.b32.xlu1 %v4037_v34, %s3624_s12 }
 0x1c7   : > { %2864 = vmatmul.mubr.msk.f32.vlgmr.msra.gmra.mrb[2].mxu0 %vm650_vm1, %v4033_v31 }
 0x230   : > { %v3208_v60 = vpop.permute.xlu1 %3207 }
 0x231   : > { %v3210_v0 = vunpack.i.h.bf16 %v3208_v60  ;;  %v3209_v2 = vunpack.i.l.bf16 %v3208_v60 }
 0x233   : > { %v3013_v6 = vpack.c.bf16 %v3210_v0, %v3209_v2 }
 0x234   : > { %v855_v11 = vpop.permute.xlu1 %854 }
 0x29a   : > { %v2865_v48 = vpop.f32.mrb[2].mxu0 }
 0x29b   : > { %v729_v50 = vpop.f32.mrb[3].mxu0  ;;  %v739_v51 = vmul.f32 %v4055_v45, %v2865_v48 }
 0x29c   : > { %v738_v52 = vmul.f32 %v4061_v47, %v729_v50 }
 0x29d   : > { %v741_v55 = vsel %vm649_vm5, %v739_v51, -1e+09 }
 0x29e   : > { %v740_v53 = vsel %vm648_vm3, %v738_v52, -1e+09  ;;  %v746_v56 = vsel %vm742_vm4, %v741_v55, -inf }
 0x29f   : > { %v743_v54 = vsel %vm742_vm4, %v740_v53, -inf }
 0x2a0   : > { %744 = vmax.xlane.f32.xlu0 %v743_v54 }
 0x2a4   : > { %747 = vmax.xlane.f32.xlu0 %v746_v56 }
 0x2ba   : > { %3202 = vrot.lane.b32.xlu0 %v4035_v32, %s3625_s20 }
 0x32d   : > { %v745_v57 = vpop.xlane.xlu0 %744 }
 0x32e   : > { %v749_v58 = vsub.f32 %v740_v53, %v745_v57 }
 0x330   : > { %v751_v62 = vmul.f32 1.442695, %v749_v58 }
 0x331   : > { %v748_v59 = vpop.xlane.xlu0 %747 }
 0x332   : > { %v750_v61 = vsub.f32 %v741_v55, %v748_v59 }
 0x334   : > { %v753_v63 = vmul.f32 1.442695, %v750_v61 }
 0x335   : > { %v3203_v1 = vpop.permute.xlu0 %3202 }
 0x336   : > { %3284 = vpow2.f32 %v753_v63  ;;  %v3205_v3 = vunpack.i.h.bf16 %v3203_v1  ;;  %v3204_v4 = vunpack.i.l.bf16 %v3203_v1 }
 0x337   : > { %3286 = vpow2.f32 %v751_v62 }
 0x338   : > { %v3009_v5 = vpack.c.bf16 %v3205_v3, %v3204_v4 }
 0x33a   : > { %3010 = vmatprep.subr.bf16.mxu1 %v3009_v5 }
 0x33b   : > { %3012 = vmatpush3.bf16.msra.mxu1 %v3009_v5 }
 0x33c   : > { %3015 = vmatprep.subr.msk.bf16.mxu1 %vm4029_vm2, %v3013_v6 }
 0x340   : > { %v3285_v7 = vpop.eup %3284 }
 0x341   : > { %v758_v8 = vsel %vm742_vm4, %v3285_v7, 0.0  ;;  %v3287_v9 = vpop.eup %3286 }
 0x342   : > { %759 = vadd.xlane.f32.xlu1 %v758_v8  ;;  %v755_v10 = vsel %vm742_vm4, %v3287_v9, 0.0 }
 0x346   : > { %756 = vadd.xlane.f32.xlu1 %v755_v10 }
 0x357   : > { %856 = vrot.lane.b32.xlu1 %v4033_v31, %s3624_s12  ;;  %s4475_s12 = sld [smem:[#allocation32_spill]] }
 0x35d   : > { %s4340_s20 = scalar_lea.hbm %s4475_s12, %s2735_s26 }
 0x3cf   : > { %v760_v12 = vpop.xlane.xlu1 %759 }
 0x3d0   : > { %3288 = vrcp.f32 %v760_v12 }
 0x3d3   : > { %v757_v13 = vpop.xlane.xlu1 %756 }
 0x3d4   : > { %3290 = vrcp.f32 %v757_v13 }
 0x3d7   : > { %v857_v18 = vpop.permute.xlu1 %856 }
 0x3da   : > { %v3289_v14 = vpop.eup %3288 }
 0x3db   : > { %v764_v15 = vmul.f32 %v3289_v14, %v3285_v7 }
 0x3dd   : > { %766 = vst.msk [vmem:[%s4085_s0 + $0x8] sm:$0xff] %vm742_vm4, %v764_v15 }
 0x3de   : > { %v3291_v16 = vpop.eup %3290 }
 0x3df   : > { %v763_v17 = vmul.f32 %v3291_v16, %v3287_v9 }
 0x3e1   : > { %765 = vst.msk [vmem:[%s4085_s0] sm:$0xff] %vm742_vm4, %v763_v17  ;;  %2870 = vmatprep.mubr.msk.f32.mxu1 %vm742_vm4, %v763_v17 }
 0x3e2   : > { %2871 = vmatmul.mubr.msk.f32.vlgmr.msra.gmra.mrb[2].mxu1 %vm742_vm4, %v764_v15 }
 0x3e3   : > { %3018 = vmatpush3.bf16.xpose.msk.msra.mxu1 %vm4029_vm2, %v3013_v6  ;;  %2877 = vmatprep.mubr.msk.f32.mxu1 %vm650_vm1, %v855_v11 }
 0x3ea   : > { %2878 = vmatmul.mubr.msk.f32.vlgmr.msra.gmra.mrb[4].mxu1 %vm650_vm1, %v857_v18 }
 0x4b5   : > { %v4097_v19 = vpop.f32.mrb[2].mxu1 }
 0x4b6   : > { %v4099_v20 = vpop.f32.mrb[3].mxu1 }
 0x4bd   : > { %v2879_v21 = vpop.f32.mrb[4].mxu1 }
 0x4be   : > { %v946_v22 = vmul.f32 %v4055_v45, %v2879_v21  ;;  %v936_v23 = vpop.f32.mrb[5].mxu1 }
 0x4bf   : > { %v945_v24 = vmul.f32 %v4061_v47, %v936_v23 }
 0x4c0   : > { %v948_v25 = vsel %vm649_vm5, %v946_v22, -1e+09 }
 0x4c1   : > { %v952_v26 = vsel %vm742_vm4, %v948_v25, -inf  ;;  %v947_v27 = vsel %vm648_vm3, %v945_v24, -1e+09 }
 0x4c2   : > { %953 = vmax.xlane.f32.xlu1 %v952_v26  ;;  %v949_v28 = vsel %vm742_vm4, %v947_v27, -inf }
 0x4c3   : > { %950 = vmax.xlane.f32.xlu0 %v949_v28 }
 0x4d3   : > { %3217 = vrot.lane.b32.xlu1 %v4035_v32, %s3626_s14 }
 0x4d7   : > { %1061 = vrot.lane.b32.xlu1 %v4037_v34, %s3626_s14 }
 0x4db   : > { %1063 = vrot.lane.b32.xlu1 %v4033_v31, %s3626_s14  ;;  %s3524_s14 = scalar_lea.vmem %s4333_s15, 256 }
 0x4dc   : > { %p3525_p0 = scmp.ne.s32.totalorder %s4333_s15, %s3524_s14 }
 0x4de   : > { %p3526_p4 = pnand %p3525_p0, %p4476_p6 }
 0x4e0   : > { %p3527_p1 = pneg %p3526_p4 }
 0x54f   : > { %v954_v29 = vpop.xlane.xlu1 %953 }
 0x550   : > { %v956_v33 = vsub.f32 %v948_v25, %v954_v29  ;;  %v951_v35 = vpop.xlane.xlu0 %950 }
 0x551   : > { %v955_v36 = vsub.f32 %v947_v27, %v951_v35 }
 0x552   : > { %v959_v37 = vmul.f32 1.442695, %v956_v33 }
 0x553   : > { %v957_v38 = vmul.f32 1.442695, %v955_v36  ;;  %v3218_v48 = vpop.permute.xlu1 %3217 }
 0x554   : > { %3292 = vpow2.f32 %v959_v37  ;;  %v3220_v51 = vunpack.i.h.bf16 %v3218_v48  ;;  %v3219_v52 = vunpack.i.l.bf16 %v3218_v48 }
 0x555   : > { %3294 = vpow2.f32 %v957_v38 }
 0x556   : > { %v3023_v58 = vpack.c.bf16 %v3220_v51, %v3219_v52 }
 0x557   : > { %v1062_v61 = vpop.permute.xlu1 %1061 }
 0x55b   : > { %v1064_v62 = vpop.permute.xlu1 %1063 }
 0x55e   : > { %v3293_v39 = vpop.eup %3292 }
 0x55f   : > { %v964_v40 = vsel %vm742_vm4, %v3293_v39, 0.0  ;;  %v3295_v41 = vpop.eup %3294 }
 0x560   : > { %965 = vadd.xlane.f32.xlu0 %v964_v40  ;;  %v961_v42 = vsel %vm742_vm4, %v3295_v41, 0.0 }
 0x564   : > { %962 = vadd.xlane.f32.xlu0 %v961_v42 }
 0x57a   : > { %3212 = vrot.lane.b32.xlu0 %v4035_v32, %s3627_s29 }
 0x5ed   : > { %v966_v43 = vpop.xlane.xlu0 %965 }
 0x5ee   : > { %3296 = vrcp.f32 %v966_v43 }
 0x5f1   : > { %v963_v44 = vpop.xlane.xlu0 %962 }
 0x5f2   : > { %3298 = vrcp.f32 %v963_v44 }
 0x5f5   : > { %v3213_v50 = vpop.permute.xlu0 %3212 }
 0x5f6   : > { %v3215_v53 = vunpack.i.h.bf16 %v3213_v50  ;;  %v3214_v54 = vunpack.i.l.bf16 %v3213_v50 }
 0x5f8   : > { %v3297_v55 = vpop.eup %3296  ;;  %v3019_v56 = vpack.c.bf16 %v3215_v53, %v3214_v54 }
 0x5f9   : > { %v970_v57 = vmul.f32 %v3297_v55, %v3293_v39 }
 0x5fa   : > { %3020 = vmatprep.subr.bf16.mxu0 %v3019_v56 }
 0x5fb   : > { %2672 = vst.msk [vmem:[%s4085_s0 + $0x18] sm:$0xff] %vm742_vm4, %v970_v57  ;;  %3022 = vmatpush3.bf16.msra.mxu0 %v3019_v56 }
 0x5fc   : > { %v3299_v59 = vpop.eup %3298  ;;  %3025 = vmatprep.subr.msk.bf16.mxu0 %vm4029_vm2, %v3023_v58 }
 0x5fd   : > { %v969_v60 = vmul.f32 %v3299_v59, %v3295_v41 }
 0x5ff   : > { %2671 = vst.msk [vmem:[%s4085_s0 + $0x10] sm:$0xff] %vm742_vm4, %v969_v60  ;;  %2884 = vmatprep.mubr.msk.f32.mxu0 %vm742_vm4, %v969_v60 }
 0x600   : > { %2885 = vmatmul.mubr.msk.f32.vlgmr.msra.gmra.mrb[4].mxu0 %vm742_vm4, %v970_v57 }
 0x601   : > { %2891 = vmatprep.mubr.msk.f32.mxu0 %vm650_vm1, %v1062_v61 }
 0x604   : > { %3028 = vmatpush3.bf16.xpose.msk.msra.mxu0 %vm4029_vm2, %v3023_v58 }
 0x60b   : > { %2892 = vmatmul.mubr.msk.f32.vlgmr.msra.gmra.mrb[6].mxu0 %vm650_vm1, %v1064_v62 }
 0x6d3   : > { %v4128_v63 = vpop.f32.mrb[4].mxu0 }
 0x6d4   : > { %v4130_v0 = vpop.f32.mrb[5].mxu0 }
 0x6de   : > { %v2893_v1 = vpop.f32.mrb[6].mxu0 }
 0x6df   : > { %v1153_v2 = vmul.f32 %v4055_v45, %v2893_v1  ;;  %v1143_v3 = vpop.f32.mrb[7].mxu0 }
 0x6e0   : > { %v1152_v4 = vmul.f32 %v4061_v47, %v1143_v3 }
 0x6e1   : > { %v1155_v5 = vsel %vm649_vm5, %v1153_v2, -1e+09 }
 0x6e2   : > { %v1159_v6 = vsel %vm742_vm4, %v1155_v5, -inf  ;;  %v1154_v7 = vsel %vm648_vm3, %v1152_v4, -1e+09 }
 0x6e3   : > { %1160 = vmax.xlane.f32.xlu1 %v1159_v6  ;;  %v1156_v8 = vsel %vm742_vm4, %v1154_v7, -inf }
 0x6e4   : > { %1157 = vmax.xlane.f32.xlu0 %v1156_v8 }
 0x6f4   : > { %3227 = vrot.lane.b32.xlu1 %v4035_v32, %s3628_s19 }
 0x6f8   : > { %1268 = vrot.lane.b32.xlu1 %v4037_v34, %s3628_s19 }
 0x6fc   : > { %1270 = vrot.lane.b32.xlu1 %v4033_v31, %s3628_s19 }
 0x770   : > { %v1161_v9 = vpop.xlane.xlu1 %1160 }
 0x771   : > { %v1163_v10 = vsub.f32 %v1155_v5, %v1161_v9  ;;  %v1158_v11 = vpop.xlane.xlu0 %1157 }
 0x772   : > { %v1162_v12 = vsub.f32 %v1154_v7, %v1158_v11 }
 0x773   : > { %v1166_v13 = vmul.f32 1.442695, %v1163_v10 }
 0x774   : > { %v1164_v14 = vmul.f32 1.442695, %v1162_v12  ;;  %v3228_v23 = vpop.permute.xlu1 %3227 }
 0x775   : > { %3300 = vpow2.f32 %v1166_v13  ;;  %v3230_v25 = vunpack.i.h.bf16 %v3228_v23  ;;  %v3229_v26 = vunpack.i.l.bf16 %v3228_v23 }
 0x776   : > { %3302 = vpow2.f32 %v1164_v14 }
 0x777   : > { %v3033_v36 = vpack.c.bf16 %v3230_v25, %v3229_v26 }
 0x778   : > { %v1269_v39 = vpop.permute.xlu1 %1268 }
 0x77c   : > { %v1271_v40 = vpop.permute.xlu1 %1270 }
 0x77f   : > { %v3301_v15 = vpop.eup %3300 }
 0x780   : > { %v1171_v16 = vsel %vm742_vm4, %v3301_v15, 0.0  ;;  %v3303_v17 = vpop.eup %3302 }
 0x781   : > { %1172 = vadd.xlane.f32.xlu0 %v1171_v16  ;;  %v1168_v18 = vsel %vm742_vm4, %v3303_v17, 0.0 }
 0x785   : > { %1169 = vadd.xlane.f32.xlu0 %v1168_v18 }
 0x79b   : > { %3222 = vrot.lane.b32.xlu0 %v4035_v32, %s3629_s10 }
 0x80e   : > { %v1173_v21 = vpop.xlane.xlu0 %1172 }
 0x80f   : > { %3304 = vrcp.f32 %v1173_v21 }
 0x812   : > { %v1170_v22 = vpop.xlane.xlu0 %1169 }
 0x813   : > { %3306 = vrcp.f32 %v1170_v22 }
 0x816   : > { %v3223_v24 = vpop.permute.xlu0 %3222 }
 0x817   : > { %v3225_v27 = vunpack.i.h.bf16 %v3223_v24  ;;  %v3224_v28 = vunpack.i.l.bf16 %v3223_v24 }
 0x819   : > { %v3305_v29 = vpop.eup %3304  ;;  %v3029_v33 = vpack.c.bf16 %v3225_v27, %v3224_v28 }
 0x81a   : > { %v1177_v35 = vmul.f32 %v3305_v29, %v3301_v15 }
 0x81b   : > { %3030 = vmatprep.subr.bf16.mxu1 %v3029_v33 }
 0x81c   : > { %2680 = vst.msk [vmem:[%s4085_s0 + $0x28] sm:$0xff] %vm742_vm4, %v1177_v35  ;;  %3032 = vmatpush3.bf16.msra.mxu1 %v3029_v33 }
 0x81d   : > { %v3307_v37 = vpop.eup %3306  ;;  %3035 = vmatprep.subr.msk.bf16.mxu1 %vm4029_vm2, %v3033_v36 }
 0x81e   : > { %v1176_v38 = vmul.f32 %v3307_v37, %v3303_v17 }
 0x820   : > { %2679 = vst.msk [vmem:[%s4085_s0 + $0x20] sm:$0xff] %vm742_vm4, %v1176_v38  ;;  %2898 = vmatprep.mubr.msk.f32.mxu1 %vm742_vm4, %v1176_v38 }
 0x821   : > { %2899 = vmatmul.mubr.msk.f32.vlgmr.msra.gmra.mrb[6].mxu1 %vm742_vm4, %v1177_v35 }
 0x822   : > { %2905 = vmatprep.mubr.msk.f32.mxu1 %vm650_vm1, %v1269_v39 }
 0x825   : > { %3038 = vmatpush3.bf16.xpose.msk.msra.mxu1 %vm4029_vm2, %v3033_v36 }
 0x82c   : > { %2906 = vmatmul.mubr.msk.f32.vlgmr.msra.gmra.mrb[8].mxu1 %vm650_vm1, %v1271_v40 }
 0x8f4   : > { %v4159_v41 = vpop.f32.mrb[6].mxu1 }
 0x8f5   : > { %v4161_v42 = vpop.f32.mrb[7].mxu1 }
 0x8ff   : > { %v2907_v43 = vpop.f32.mrb[8].mxu1 }
 0x900   : > { %v1360_v44 = vmul.f32 %v4055_v45, %v2907_v43  ;;  %v1350_v48 = vpop.f32.mrb[9].mxu1 }
 0x901   : > { %v1359_v50 = vmul.f32 %v4061_v47, %v1350_v48 }
 0x902   : > { %v1362_v51 = vsel %vm649_vm5, %v1360_v44, -1e+09 }
 0x903   : > { %v1366_v52 = vsel %vm742_vm4, %v1362_v51, -inf  ;;  %v1361_v53 = vsel %vm648_vm3, %v1359_v50, -1e+09 }
 0x904   : > { %1367 = vmax.xlane.f32.xlu1 %v1366_v52  ;;  %v1363_v54 = vsel %vm742_vm4, %v1361_v53, -inf }
 0x905   : > { %1364 = vmax.xlane.f32.xlu0 %v1363_v54 }
 0x915   : > { %3237 = vrot.lane.b32.xlu1 %v4035_v32, %s3630_s23 }
 0x919   : > { %1475 = vrot.lane.b32.xlu1 %v4037_v34, %s3630_s23 }
 0x91d   : > { %1477 = vrot.lane.b32.xlu1 %v4033_v31, %s3630_s23 }
 0x991   : > { %v1368_v55 = vpop.xlane.xlu1 %1367 }
 0x992   : > { %v1370_v56 = vsub.f32 %v1362_v51, %v1368_v55  ;;  %v1365_v57 = vpop.xlane.xlu0 %1364 }
 0x993   : > { %v1369_v58 = vsub.f32 %v1361_v53, %v1365_v57 }
 0x994   : > { %v1373_v59 = vmul.f32 1.442695, %v1370_v56 }
 0x995   : > { %v1371_v60 = vmul.f32 1.442695, %v1369_v58  ;;  %v3238_v5 = vpop.permute.xlu1 %3237 }
 0x996   : > { %3308 = vpow2.f32 %v1373_v59  ;;  %v3240_v7 = vunpack.i.h.bf16 %v3238_v5  ;;  %v3239_v8 = vunpack.i.l.bf16 %v3238_v5 }
 0x997   : > { %3310 = vpow2.f32 %v1371_v60 }
 0x998   : > { %v3043_v14 = vpack.c.bf16 %v3240_v7, %v3239_v8 }
 0x999   : > { %v1476_v17 = vpop.permute.xlu1 %1475 }
 0x99d   : > { %v1478_v18 = vpop.permute.xlu1 %1477 }
 0x9a0   : > { %v3309_v61 = vpop.eup %3308 }
 0x9a1   : > { %v1378_v62 = vsel %vm742_vm4, %v3309_v61, 0.0  ;;  %v3311_v1 = vpop.eup %3310 }
 0x9a2   : > { %1379 = vadd.xlane.f32.xlu0 %v1378_v62  ;;  %v1375_v2 = vsel %vm742_vm4, %v3311_v1, 0.0 }
 0x9a6   : > { %1376 = vadd.xlane.f32.xlu0 %v1375_v2 }
 0x9bc   : > { %3232 = vrot.lane.b32.xlu0 %v4035_v32, %s3631_s8 }
 0xa2f   : > { %v1380_v3 = vpop.xlane.xlu0 %1379 }
 0xa30   : > { %3312 = vrcp.f32 %v1380_v3 }
 0xa33   : > { %v1377_v4 = vpop.xlane.xlu0 %1376 }
 0xa34   : > { %3314 = vrcp.f32 %v1377_v4 }
 0xa37   : > { %v3233_v6 = vpop.permute.xlu0 %3232 }
 0xa38   : > { %v3235_v9 = vunpack.i.h.bf16 %v3233_v6  ;;  %v3234_v10 = vunpack.i.l.bf16 %v3233_v6 }
 0xa3a   : > { %v3313_v11 = vpop.eup %3312  ;;  %v3039_v12 = vpack.c.bf16 %v3235_v9, %v3234_v10 }
 0xa3b   : > { %v1384_v13 = vmul.f32 %v3313_v11, %v3309_v61 }
 0xa3c   : > { %3040 = vmatprep.subr.bf16.mxu0 %v3039_v12 }
 0xa3d   : > { %2688 = vst.msk [vmem:[%s4085_s0 + $0x38] sm:$0xff] %vm742_vm4, %v1384_v13  ;;  %3042 = vmatpush3.bf16.msra.mxu0 %v3039_v12 }
 0xa3e   : > { %v3315_v15 = vpop.eup %3314  ;;  %3045 = vmatprep.subr.msk.bf16.mxu0 %vm4029_vm2, %v3043_v14 }
 0xa3f   : > { %v1383_v16 = vmul.f32 %v3315_v15, %v3311_v1 }
 0xa41   : > { %2687 = vst.msk [vmem:[%s4085_s0 + $0x30] sm:$0xff] %vm742_vm4, %v1383_v16  ;;  %2912 = vmatprep.mubr.msk.f32.mxu0 %vm742_vm4, %v1383_v16 }
 0xa42   : > { %2913 = vmatmul.mubr.msk.f32.vlgmr.msra.gmra.mrb[8].mxu0 %vm742_vm4, %v1384_v13 }
 0xa43   : > { %2919 = vmatprep.mubr.msk.f32.mxu0 %vm650_vm1, %v1476_v17 }
 0xa46   : > { %3048 = vmatpush3.bf16.xpose.msk.msra.mxu0 %vm4029_vm2, %v3043_v14 }
 0xa4d   : > { %2920 = vmatmul.mubr.msk.f32.vlgmr.msra.gmra.mrb[10].mxu0 %vm650_vm1, %v1478_v18 }
 0xb15   : > { %v4190_v21 = vpop.f32.mrb[8].mxu0 }
 0xb16   : > { %v4192_v22 = vpop.f32.mrb[9].mxu0 }
 0xb20   : > { %v2921_v23 = vpop.f32.mrb[10].mxu0 }
 0xb21   : > { %v1567_v24 = vmul.f32 %v4055_v45, %v2921_v23  ;;  %v1557_v25 = vpop.f32.mrb[11].mxu0 }
 0xb22   : > { %v1566_v26 = vmul.f32 %v4061_v47, %v1557_v25 }
 0xb23   : > { %v1569_v27 = vsel %vm649_vm5, %v1567_v24, -1e+09 }
 0xb24   : > { %v1573_v28 = vsel %vm742_vm4, %v1569_v27, -inf  ;;  %v1568_v29 = vsel %vm648_vm3, %v1566_v26, -1e+09 }
 0xb25   : > { %1574 = vmax.xlane.f32.xlu1 %v1573_v28  ;;  %v1570_v33 = vsel %vm742_vm4, %v1568_v29, -inf }
 0xb26   : > { %1571 = vmax.xlane.f32.xlu0 %v1570_v33 }
 0xb36   : > { %3247 = vrot.lane.b32.xlu1 %v4035_v32, %s3632_s9 }
 0xb3a   : > { %1682 = vrot.lane.b32.xlu1 %v4037_v34, %s3632_s9 }
 0xb3e   : > { %1684 = vrot.lane.b32.xlu1 %v4033_v31, %s3632_s9 }
 0xbb2   : > { %v1575_v35 = vpop.xlane.xlu1 %1574 }
 0xbb3   : > { %v1577_v36 = vsub.f32 %v1569_v27, %v1575_v35  ;;  %v1572_v37 = vpop.xlane.xlu0 %1571 }
 0xbb4   : > { %v1576_v38 = vsub.f32 %v1568_v29, %v1572_v37 }
 0xbb5   : > { %v1580_v39 = vmul.f32 1.442695, %v1577_v36 }
 0xbb6   : > { %v1578_v40 = vmul.f32 1.442695, %v1576_v38  ;;  %v3248_v53 = vpop.permute.xlu1 %3247 }
 0xbb7   : > { %3316 = vpow2.f32 %v1580_v39  ;;  %v3250_v55 = vunpack.i.h.bf16 %v3248_v53  ;;  %v3249_v56 = vunpack.i.l.bf16 %v3248_v53 }
 0xbb8   : > { %3318 = vpow2.f32 %v1578_v40 }
 0xbb9   : > { %v3053_v62 = vpack.c.bf16 %v3250_v55, %v3249_v56 }
 0xbba   : > { %v1683_v3 = vpop.permute.xlu1 %1682 }
 0xbbe   : > { %v1685_v4 = vpop.permute.xlu1 %1684 }
 0xbc1   : > { %v3317_v43 = vpop.eup %3316 }
 0xbc2   : > { %v1585_v44 = vsel %vm742_vm4, %v3317_v43, 0.0  ;;  %v3319_v48 = vpop.eup %3318 }
 0xbc3   : > { %1586 = vadd.xlane.f32.xlu0 %v1585_v44  ;;  %v1582_v50 = vsel %vm742_vm4, %v3319_v48, 0.0 }
 0xbc7   : > { %1583 = vadd.xlane.f32.xlu0 %v1582_v50 }
 0xbdd   : > { %3242 = vrot.lane.b32.xlu0 %v4035_v32, %s3633_s2 }
 0xc50   : > { %v1587_v51 = vpop.xlane.xlu0 %1586 }
 0xc51   : > { %3320 = vrcp.f32 %v1587_v51 }
 0xc54   : > { %v1584_v52 = vpop.xlane.xlu0 %1583 }
 0xc55   : > { %3322 = vrcp.f32 %v1584_v52 }
 0xc58   : > { %v3243_v54 = vpop.permute.xlu0 %3242 }
 0xc59   : > { %v3245_v57 = vunpack.i.h.bf16 %v3243_v54  ;;  %v3244_v58 = vunpack.i.l.bf16 %v3243_v54 }
 0xc5b   : > { %v3321_v59 = vpop.eup %3320  ;;  %v3049_v60 = vpack.c.bf16 %v3245_v57, %v3244_v58 }
 0xc5c   : > { %v1591_v61 = vmul.f32 %v3321_v59, %v3317_v43 }
 0xc5d   : > { %3050 = vmatprep.subr.bf16.mxu1 %v3049_v60 }
 0xc5e   : > { %2696 = vst.msk [vmem:[%s4085_s0 + $0x48] sm:$0xff] %vm742_vm4, %v1591_v61  ;;  %3052 = vmatpush3.bf16.msra.mxu1 %v3049_v60 }
 0xc5f   : > { %v3323_v1 = vpop.eup %3322  ;;  %3055 = vmatprep.subr.msk.bf16.mxu1 %vm4029_vm2, %v3053_v62 }
 0xc60   : > { %v1590_v2 = vmul.f32 %v3323_v1, %v3319_v48 }
 0xc62   : > { %2695 = vst.msk [vmem:[%s4085_s0 + $0x40] sm:$0xff] %vm742_vm4, %v1590_v2  ;;  %2926 = vmatprep.mubr.msk.f32.mxu1 %vm742_vm4, %v1590_v2 }
 0xc63   : > { %2927 = vmatmul.mubr.msk.f32.vlgmr.msra.gmra.mrb[10].mxu1 %vm742_vm4, %v1591_v61 }
 0xc64   : > { %2933 = vmatprep.mubr.msk.f32.mxu1 %vm650_vm1, %v1683_v3 }
 0xc67   : > { %3058 = vmatpush3.bf16.xpose.msk.msra.mxu1 %vm4029_vm2, %v3053_v62 }
 0xc6e   : > { %2934 = vmatmul.mubr.msk.f32.vlgmr.msra.gmra.mrb[12].mxu1 %vm650_vm1, %v1685_v4 }
 0xd36   : > { %v4221_v5 = vpop.f32.mrb[10].mxu1 }
 0xd37   : > { %v4223_v6 = vpop.f32.mrb[11].mxu1 }
 0xd41   : > { %v2935_v7 = vpop.f32.mrb[12].mxu1 }
 0xd42   : > { %v1774_v8 = vmul.f32 %v4055_v45, %v2935_v7  ;;  %v1764_v9 = vpop.f32.mrb[13].mxu1 }
 0xd43   : > { %v1773_v10 = vmul.f32 %v4061_v47, %v1764_v9 }
 0xd44   : > { %v1776_v11 = vsel %vm649_vm5, %v1774_v8, -1e+09 }
 0xd45   : > { %v1780_v12 = vsel %vm742_vm4, %v1776_v11, -inf  ;;  %v1775_v13 = vsel %vm648_vm3, %v1773_v10, -1e+09 }
 0xd46   : > { %1781 = vmax.xlane.f32.xlu1 %v1780_v12  ;;  %v1777_v14 = vsel %vm742_vm4, %v1775_v13, -inf }
 0xd47   : > { %1778 = vmax.xlane.f32.xlu0 %v1777_v14 }
 0xd57   : > { %3257 = vrot.lane.b32.xlu1 %v4035_v32, %s3634_s21 }
 0xd5b   : > { %1889 = vrot.lane.b32.xlu1 %v4037_v34, %s3634_s21 }
 0xd5f   : > { %1891 = vrot.lane.b32.xlu1 %v4033_v31, %s3634_s21 }
 0xdd3   : > { %v1782_v15 = vpop.xlane.xlu1 %1781 }
 0xdd4   : > { %v1784_v16 = vsub.f32 %v1776_v11, %v1782_v15  ;;  %v1779_v17 = vpop.xlane.xlu0 %1778 }
 0xdd5   : > { %v1783_v18 = vsub.f32 %v1775_v13, %v1779_v17 }
 0xdd6   : > { %v1787_v23 = vmul.f32 1.442695, %v1784_v16 }
 0xdd7   : > { %v1785_v24 = vmul.f32 1.442695, %v1783_v18  ;;  %v3258_v35 = vpop.permute.xlu1 %3257 }
 0xdd8   : > { %3324 = vpow2.f32 %v1787_v23  ;;  %v3260_v37 = vunpack.i.h.bf16 %v3258_v35  ;;  %v3259_v38 = vunpack.i.l.bf16 %v3258_v35 }
 0xdd9   : > { %3326 = vpow2.f32 %v1785_v24 }
 0xdda   : > { %v3063_v50 = vpack.c.bf16 %v3260_v37, %v3259_v38 }
 0xddb   : > { %v1890_v53 = vpop.permute.xlu1 %1889 }
 0xddf   : > { %v1892_v54 = vpop.permute.xlu1 %1891 }
 0xde2   : > { %v3325_v25 = vpop.eup %3324 }
 0xde3   : > { %v1792_v26 = vsel %vm742_vm4, %v3325_v25, 0.0  ;;  %v3327_v27 = vpop.eup %3326 }
 0xde4   : > { %1793 = vadd.xlane.f32.xlu0 %v1792_v26  ;;  %v1789_v28 = vsel %vm742_vm4, %v3327_v27, 0.0 }
 0xde8   : > { %1790 = vadd.xlane.f32.xlu0 %v1789_v28 }
 0xdfe   : > { %3252 = vrot.lane.b32.xlu0 %v4035_v32, %s3635_s6 }
 0xe71   : > { %v1794_v29 = vpop.xlane.xlu0 %1793 }
 0xe72   : > { %3328 = vrcp.f32 %v1794_v29 }
 0xe75   : > { %v1791_v33 = vpop.xlane.xlu0 %1790 }
 0xe76   : > { %3330 = vrcp.f32 %v1791_v33 }
 0xe79   : > { %v3253_v36 = vpop.permute.xlu0 %3252 }
 0xe7a   : > { %v3255_v39 = vunpack.i.h.bf16 %v3253_v36  ;;  %v3254_v40 = vunpack.i.l.bf16 %v3253_v36 }
 0xe7c   : > { %v3329_v43 = vpop.eup %3328  ;;  %v3059_v44 = vpack.c.bf16 %v3255_v39, %v3254_v40 }
 0xe7d   : > { %v1798_v48 = vmul.f32 %v3329_v43, %v3325_v25 }
 0xe7e   : > { %3060 = vmatprep.subr.bf16.mxu0 %v3059_v44 }
 0xe7f   : > { %2704 = vst.msk [vmem:[%s4085_s0 + $0x58] sm:$0xff] %vm742_vm4, %v1798_v48  ;;  %3062 = vmatpush3.bf16.msra.mxu0 %v3059_v44 }
 0xe80   : > { %v3331_v51 = vpop.eup %3330  ;;  %3065 = vmatprep.subr.msk.bf16.mxu0 %vm4029_vm2, %v3063_v50 }
 0xe81   : > { %v1797_v52 = vmul.f32 %v3331_v51, %v3327_v27 }
 0xe83   : > { %2703 = vst.msk [vmem:[%s4085_s0 + $0x50] sm:$0xff] %vm742_vm4, %v1797_v52  ;;  %2940 = vmatprep.mubr.msk.f32.mxu0 %vm742_vm4, %v1797_v52 }
 0xe84   : > { %2941 = vmatmul.mubr.msk.f32.vlgmr.msra.gmra.mrb[12].mxu0 %vm742_vm4, %v1798_v48 }
 0xe85   : > { %2947 = vmatprep.mubr.msk.f32.mxu0 %vm650_vm1, %v1890_v53 }
 0xe88   : > { %3068 = vmatpush3.bf16.xpose.msk.msra.mxu0 %vm4029_vm2, %v3063_v50 }
 0xe8f   : > { %2948 = vmatmul.mubr.msk.f32.vlgmr.msra.gmra.mrb[14].mxu0 %vm650_vm1, %v1892_v54 }
 0xf57   : > { %v4252_v55 = vpop.f32.mrb[12].mxu0 }
 0xf58   : > { %v4254_v56 = vpop.f32.mrb[13].mxu0 }
 0xf62   : > { %v2949_v57 = vpop.f32.mrb[14].mxu0 }
 0xf63   : > { %v1981_v58 = vmul.f32 %v4055_v45, %v2949_v57  ;;  %v1971_v59 = vpop.f32.mrb[15].mxu0 }
 0xf64   : > { %v1980_v60 = vmul.f32 %v4061_v47, %v1971_v59 }
 0xf65   : > { %v1983_v61 = vsel %vm649_vm5, %v1981_v58, -1e+09 }
 0xf66   : > { %v1987_v62 = vsel %vm742_vm4, %v1983_v61, -inf  ;;  %v1982_v1 = vsel %vm648_vm3, %v1980_v60, -1e+09 }
 0xf67   : > { %1988 = vmax.xlane.f32.xlu1 %v1987_v62  ;;  %v1984_v2 = vsel %vm742_vm4, %v1982_v1, -inf }
 0xf68   : > { %1985 = vmax.xlane.f32.xlu0 %v1984_v2 }
 0xf78   : > { %3267 = vrot.lane.b32.xlu1 %v4035_v32, %s3636_s11 }
 0xf7c   : > { %2096 = vrot.lane.b32.xlu1 %v4037_v34, %s3636_s11 }
 0xf80   : > { %2098 = vrot.lane.b32.xlu1 %v4033_v31, %s3636_s11 }
 0xff4   : > { %v1989_v3 = vpop.xlane.xlu1 %1988 }
 0xff5   : > { %v1991_v4 = vsub.f32 %v1983_v61, %v1989_v3  ;;  %v1986_v7 = vpop.xlane.xlu0 %1985 }
 0xff6   : > { %v1990_v8 = vsub.f32 %v1982_v1, %v1986_v7 }
 0xff7   : > { %v1994_v9 = vmul.f32 1.442695, %v1991_v4 }
 0xff8   : > { %v1992_v10 = vmul.f32 1.442695, %v1990_v8  ;;  %v3268_v15 = vpop.permute.xlu1 %3267 }
 0xff9   : > { %3332 = vpow2.f32 %v1994_v9  ;;  %v3270_v17 = vunpack.i.h.bf16 %v3268_v15  ;;  %v3269_v18 = vunpack.i.l.bf16 %v3268_v15 }
 0xffa   : > { %3334 = vpow2.f32 %v1992_v10 }
 0xffb   : > { %v3073_v28 = vpack.c.bf16 %v3270_v17, %v3269_v18 }
 0xffc   : > { %v2097_v35 = vpop.permute.xlu1 %2096 }
0x1000   : > { %v2099_v36 = vpop.permute.xlu1 %2098 }
0x1003   : > { %v3333_v11 = vpop.eup %3332 }
0x1004   : > { %v1999_v12 = vsel %vm742_vm4, %v3333_v11, 0.0  ;;  %v3335_v13 = vpop.eup %3334 }
0x1005   : > { %2000 = vadd.xlane.f32.xlu0 %v1999_v12  ;;  %v1996_v14 = vsel %vm742_vm4, %v3335_v13, 0.0 }
0x1009   : > { %1997 = vadd.xlane.f32.xlu0 %v1996_v14 }
0x101f   : > { %3262 = vrot.lane.b32.xlu0 %v4035_v32, %s3637_s17 }
0x1092   : > { %v2001_v31 = vpop.xlane.xlu0 %2000 }
0x1093   : > { %3336 = vrcp.f32 %v2001_v31 }
0x1096   : > { %v1998_v34 = vpop.xlane.xlu0 %1997 }
0x1097   : > { %3338 = vrcp.f32 %v1998_v34 }
0x109a   : > { %v3263_v16 = vpop.permute.xlu0 %3262 }
0x109b   : > { %v3265_v23 = vunpack.i.h.bf16 %v3263_v16  ;;  %v3264_v24 = vunpack.i.l.bf16 %v3263_v16 }
0x109d   : > { %v3337_v25 = vpop.eup %3336  ;;  %v3069_v26 = vpack.c.bf16 %v3265_v23, %v3264_v24 }
0x109e   : > { %v2005_v27 = vmul.f32 %v3337_v25, %v3333_v11 }
0x109f   : > { %3070 = vmatprep.subr.bf16.mxu1 %v3069_v26 }
0x10a0   : > { %2712 = vst.msk [vmem:[%s4085_s0 + $0x68] sm:$0xff] %vm742_vm4, %v2005_v27  ;;  %3072 = vmatpush3.bf16.msra.mxu1 %v3069_v26 }
0x10a1   : > { %v3339_v29 = vpop.eup %3338  ;;  %3075 = vmatprep.subr.msk.bf16.mxu1 %vm4029_vm2, %v3073_v28 }
0x10a2   : > { %v2004_v33 = vmul.f32 %v3339_v29, %v3335_v13 }
0x10a4   : > { %2711 = vst.msk [vmem:[%s4085_s0 + $0x60] sm:$0xff] %vm742_vm4, %v2004_v33  ;;  %2954 = vmatprep.mubr.msk.f32.mxu1 %vm742_vm4, %v2004_v33 }
0x10a5   : > { %2955 = vmatmul.mubr.msk.f32.vlgmr.msra.gmra.mrb[14].mxu1 %vm742_vm4, %v2005_v27 }
0x10a6   : > { %2961 = vmatprep.mubr.msk.f32.mxu1 %vm650_vm1, %v2097_v35 }
0x10a9   : > { %3078 = vmatpush3.bf16.xpose.msk.msra.mxu1 %vm4029_vm2, %v3073_v28 }
0x10b0   : > { %2962 = vmatmul.mubr.msk.f32.vlgmr.msra.gmra.mrb[16].mxu1 %vm650_vm1, %v2099_v36 }
0x1178   : > { %v2956_v37 = vpop.f32.mrb[14].mxu1 }
0x1179   : > { %v2087_v38 = vpop.f32.mrb[15].mxu1 }
0x1183   : > { %v2963_v39 = vpop.f32.mrb[16].mxu1 }
0x1184   : > { %v2188_v40 = vmul.f32 %v4055_v45, %v2963_v39  ;;  %v2178_v43 = vpop.f32.mrb[17].mxu1 }
0x1185   : > { %v2187_v44 = vmul.f32 %v4061_v47, %v2178_v43 }
0x1186   : > { %v2190_v48 = vsel %vm649_vm5, %v2188_v40, -1e+09 }
0x1187   : > { %v2194_v50 = vsel %vm742_vm4, %v2190_v48, -inf  ;;  %v2189_v30 = vsel %vm648_vm3, %v2187_v44, -1e+09 }
0x1188   : > { %2195 = vmax.xlane.f32.xlu1 %v2194_v50  ;;  %v2191_v51 = vsel %vm742_vm4, %v2189_v30, -inf }
0x1189   : > { %2192 = vmax.xlane.f32.xlu0 %v2191_v51 }
0x1199   : > { %2305 = vrot.lane.b32.xlu1 %v4130_v0, %s3638_s22 }
0x119d   : > { %2307 = vrot.lane.b32.xlu1 %v4128_v63, %s3638_s22 }
0x11a1   : > { %2313 = vrot.lane.b32.xlu1 %v4161_v42, %s3637_s17 }
0x11a5   : > { %2321 = vrot.lane.b32.xlu1 %v4192_v22, %s3635_s6 }
0x11a9   : > { %2329 = vrot.lane.b32.xlu1 %v4223_v6, %s3633_s2 }
0x11ad   : > { %2337 = vrot.lane.b32.xlu1 %v4254_v56, %s3631_s8 }
0x11b1   : > { %2345 = vrot.lane.b32.xlu1 %v2087_v38, %s3629_s10 }
0x1215   : > { %v2196_v45 = vpop.xlane.xlu1 %2195 }
0x1216   : > { %v2198_v46 = vsub.f32 %v2190_v48, %v2196_v45  ;;  %v2193_v47 = vpop.xlane.xlu0 %2192 }
0x1217   : > { %v2197_v49 = vsub.f32 %v2189_v30, %v2193_v47 }
0x1218   : > { %v2201_v0 = vmul.f32 1.442695, %v2198_v46 }
0x1219   : > { %v2199_v63 = vmul.f32 1.442695, %v2197_v49  ;;  %v2306_v61 = vpop.permute.xlu1 %2305 }
0x121a   : > { %3340 = vpow2.f32 %v2201_v0  ;;  %v2359_v12 = vsel %vm650_vm1, %v4099_v20, %v2306_v61 }
0x121b   : > { %3342 = vpow2.f32 %v2199_v63 }
0x121d   : > { %v2308_v62 = vpop.permute.xlu1 %2307 }
0x121e   : > { %v2360_v11 = vsel %vm650_vm1, %v4097_v19, %v2308_v62 }
0x1221   : > { %v2314_v2 = vpop.permute.xlu1 %2313 }
0x1222   : > { %v2361_v31 = vsel %vm742_vm4, %v2359_v12, %v2314_v2 }
0x1224   : > { %v3341_v42 = vpop.eup %3340 }
0x1225   : > { %v2206_v52 = vsel %vm742_vm4, %v3341_v42, 0.0  ;;  %v3343_v22 = vpop.eup %3342  ;;  %v2322_v4 = vpop.permute.xlu1 %2321 }
0x1226   : > { %2207 = vadd.xlane.f32.xlu0 %v2206_v52  ;;  %v2203_v6 = vsel %vm742_vm4, %v3343_v22, 0.0  ;;  %v2364_v16 = vsel %vm2363_vm6, %v2361_v31, %v2322_v4 }
0x1229   : > { %v2330_v8 = vpop.permute.xlu1 %2329 }
0x122a   : > { %2204 = vadd.xlane.f32.xlu0 %v2203_v6  ;;  %v2367_v17 = vsel %vm2366_vm7, %v2364_v16, %v2330_v8 }
0x122d   : > { %v2338_v10 = vpop.permute.xlu1 %2337 }
0x122e   : > { %v2370_v18 = vsel %vm2369_vm8, %v2367_v17, %v2338_v10 }
0x1231   : > { %v2346_v34 = vpop.permute.xlu1 %2345 }
0x1232   : > { %v2373_v25 = vsel %vm2372_vm9, %v2370_v18, %v2346_v34 }
0x1240   : > { %3272 = vrot.lane.b32.xlu0 %v4035_v32, %s3638_s22 }
0x1244   : > { %2315 = vrot.lane.b32.xlu0 %v4159_v41, %s3637_s17 }
0x1248   : > { %2323 = vrot.lane.b32.xlu0 %v4190_v21, %s3635_s6 }
0x124c   : > { %2331 = vrot.lane.b32.xlu0 %v4221_v5, %s3633_s2 }
0x1250   : > { %2339 = vrot.lane.b32.xlu0 %v4252_v55, %s3631_s8 }
0x1254   : > { %2347 = vrot.lane.b32.xlu0 %v2956_v37, %s3629_s10 }
0x12b3   : > { %v2208_v53 = vpop.xlane.xlu0 %2207 }
0x12b4   : > { %3344 = vrcp.f32 %v2208_v53 }
0x12b7   : > { %v2205_v54 = vpop.xlane.xlu0 %2204 }
0x12b8   : > { %3346 = vrcp.f32 %v2205_v54 }
0x12bb   : > { %v3273_v32 = vpop.permute.xlu0 %3272 }
0x12bc   : > { %v3275_v56 = vunpack.i.h.bf16 %v3273_v32  ;;  %v3274_v41 = vunpack.i.l.bf16 %v3273_v32 }
0x12be   : > { %v3345_v57 = vpop.eup %3344  ;;  %v3079_v58 = vpack.c.bf16 %v3275_v56, %v3274_v41 }
0x12bf   : > { %v2212_v59 = vmul.f32 %v3345_v57, %v3341_v42  ;;  %v2316_v1 = vpop.permute.xlu0 %2315 }
0x12c0   : > { %3080 = vmatprep.subr.bf16.mxu0 %v3079_v58  ;;  %v2362_v13 = vsel %vm742_vm4, %v2360_v11, %v2316_v1 }
0x12c1   : > { %2720 = vst.msk [vmem:[%s4085_s0 + $0x78] sm:$0xff] %vm742_vm4, %v2212_v59  ;;  %3082 = vmatpush3.bf16.msra.mxu0 %v3079_v58 }
0x12c2   : > { %v3347_v21 = vpop.eup %3346 }
0x12c3   : > { %v2211_v5 = vmul.f32 %v3347_v21, %v3343_v22  ;;  %v2324_v3 = vpop.permute.xlu0 %2323 }
0x12c4   : > { %v2365_v15 = vsel %vm2363_vm6, %v2362_v13, %v2324_v3 }
0x12c5   : > { %2719 = vst.msk [vmem:[%s4085_s0 + $0x70] sm:$0xff] %vm742_vm4, %v2211_v5  ;;  %2968 = vmatprep.mubr.msk.f32.mxu0 %vm742_vm4, %v2211_v5 }
0x12c6   : > { %2969 = vmatmul.mubr.msk.f32.vlgmr.msra.gmra.mrb[16].mxu0 %vm742_vm4, %v2212_v59 }
0x12c7   : > { %v2332_v7 = vpop.permute.xlu0 %2331 }
0x12c8   : > { %v2368_v19 = vsel %vm2366_vm7, %v2365_v15, %v2332_v7 }
0x12cb   : > { %v2340_v9 = vpop.permute.xlu0 %2339 }
0x12cc   : > { %v2371_v20 = vsel %vm2369_vm8, %v2368_v19, %v2340_v9 }
0x12cf   : > { %v2348_v14 = vpop.permute.xlu0 %2347 }
0x12d0   : > { %v2374_v23 = vsel %vm2372_vm9, %v2371_v20, %v2348_v14 }
0x1399   : > { %v2970_v55 = vpop.f32.mrb[16].mxu0 }
0x139a   : > { %2355 = vrot.lane.b32.xlu0 %v2970_v55, %s3627_s29  ;;  %v2294_v60 = vpop.f32.mrb[17].mxu0 }
0x139b   : > { %2353 = vrot.lane.b32.xlu1 %v2294_v60, %s3627_s29  ;;  %s3639_s29 = smov [#allocation12]  }
0x139c   : > { %s3528_s19 = sshll.u32 %s3639_s29, 4  ;;  %s3529_s19 = int_to_ptr.vmem [resolvable:$false] %s3528_s19 }
0x139d   : > { %s3530_s10 = scalar_lea.vmem %s3529_s19, 512  ;;  %p3531_p11 = scmp.lt.s32.totalorder %s4333_s15, %s3529_s19 }
0x139e   : > { %p3532_p13 = scmp.lt.s32.totalorder %s3530_s10, %s3524_s14 }
0x13a0   : > { %p3533_p7 = por %p3532_p13, %p3531_p11 }
0x13a2   : > { %p3534_p2 = pnand %p3533_p7, %p3527_p1 }
0x140c   : > { %v2356_v24 = vpop.permute.xlu0 %2355 }
0x140d   : > { %v2377_v26 = vsel %vm2375_vm10, %v2374_v23, %v2356_v24  ;;  %v2354_v27 = vpop.permute.xlu1 %2353 }
0x140e   : > { %2379 = vst.msk [vmem:[%s443_s24 + $0x8] sm:$0xff] %vm463_vm0, %v2377_v26  ;;  %v2376_v28 = vsel %vm2375_vm10, %v2373_v25, %v2354_v27 }
0x140f   : > { %2378 = vst.msk [vmem:[%s443_s24] sm:$0xff] %vm463_vm0, %v2376_v28 }
0x1410   : > { %3537 = shalt.err (!%p3534_p2)
}
0x1411   : > { %s3538_s23 = scalar_lea.hbm %s4340_s20, 256  ;;  %s3542_s2 = scalar_lea.hbm %s4475_s12, 512 }
0x1412   : > { %p3539_p12 = scmp.ne.s32.totalorder %s4340_s20, %s3538_s23  ;;  %p3543_p8 = scmp.lt.u32.totalorder %s4340_s20, %s4475_s12 }
0x1413   : > { %p3544_p9 = scmp.lt.u32.totalorder %s3542_s2, %s3538_s23  ;;  %p3546_p0 = scmp.lt.u32.totalorder %s3538_s23, %s4340_s20 }
0x1414   : > { %p3540_p3 = pnand %p3539_p12, %p4476_p6 }
0x1415   : > { %p3545_p10 = por %p3544_p9, %p3543_p8 }
0x1416   : > { %p3541_p5 = pneg %p3540_p3 }
0x1417   : > { %p3547_p4 = por %p3546_p0, %p3545_p10 }
0x1419   : > { %p3548_p1 = pnand %p3547_p4, %p3541_p5 }
0x141b   : > { %3551 = shalt.err (!%p3548_p1)
}
0x141c   : > { %s3640_s11 = smov 128   ;;  %s2386_s17 = scalar_lea.sflag [#allocation14], %s3982_s7 }
0x141d   : > { %3099 = dma.vmem_to_hbm [thread:$0]  (%p4476_p6), %s4333_s15, 256, %s4340_s20, %s2381_s30, %s3640_s11, %s3640_s11, %s3638_s22  }
0x141e   : > { %s4477_s16 = sld [smem:[#allocation33_spill]]  ;;  %s2431_s29 = sshll.u32 %s4085_s0, 4  ;;  %s2432_s29 = int_to_ptr.vmem [resolvable:$true] %s2431_s29 }
0x141f   : > { %s3641_s19 = smov 256   ;;  %s3642_s7 = smov 512  }
0x1420   : > { %3100 = sst [smem:[#allocation16]] (%p4476_p6), %s3641_s19  ;;  %s3643_s28 = smov 2  }
0x1421   : > { %3101 = sst [smem:[#allocation16 + $0x1]] (%p4476_p6), %s3642_s7  ;;  %s3644_s22 = smov 128  }
0x1422   : > { %3102 = sst [smem:[#allocation16 + $0x2]] (%p4476_p6), %s3643_s28  ;;  %s3645_s15 = smov 8  }
0x1423   : > { %3103 = sst [smem:[#allocation16 + $0x3]] (%p4476_p6), %s3644_s22  ;;  %s3647_s0 = smov 0  }
0x1424   : > { %s2414_s14 = scalar_lea.hbm %s4477_s16, %s2735_s26  ;;  %3104 = sst [smem:[#allocation16 + $0x4]] (%p4476_p6), %s3644_s22 }
0x1425   : > { %3105 = sst [smem:[#allocation16 + $0x5]] (%p4476_p6), %s3645_s15  ;;  %s3646_s26 = smov [#allocation15]  }
0x1426   : > { %3106 = dma.general (%p4476_p6), %s2432_s29, 2048, %s2414_s14, %s2386_s17, %s3646_s26, [#allocation16], %s3647_s0, 0  }
0x1427 PF: > { %s4478_s20 = sld [smem:[#allocation25_spill]]  ;;  %s4479_s30 = sld [smem:[#allocation29_spill]] }
0x1428   : > { %p4481_p13 = scmp.ge.s32.totalorder %s3614_s27, 2 }
0x142d   : > { %s2459_s10 = sand.u32 1, %s4478_s20   ;;  %p4480_p11 = scmp.ne.s32.totalorder %s4479_s30, 0 }
0x142e   : > { %s2460_s23 = scalar_lea.sflag [#allocation4], %s2459_s10 }
0x142f   : > { %p3130_p7 = pnand %p4481_p13, %p4480_p11 }
0x1431   : > { %3593 = dma.done.wait (!%p3130_p7), %s2460_s23, 256  }
0x1432   : > { %3595 = vsyncadd (!%p3130_p7), %s2460_s23, 4294967040  ;;  %s2469_s8 = scalar_lea.sflag [#allocation14], %s2459_s10 }
0x1433   : > { %3597 = dma.done.wait (!%p3130_p7), %s2469_s8, 2048  }
0x1434   : > { %3599 = vsyncadd (!%p3130_p7), %s2469_s8, 4294965248  ;;  %s4482_s27 = sld [smem:[#allocation27_spill]]  ;;  %s4483_s9 = sld [smem:[#allocation26_spill]] }
0x1435   : > { %s4484_s26 = sld [smem:[#allocation28_spill]]  ;;  %s4485_s24 = smov %s3606_s25 }
0x143a   : > { %p28_p6 = scmp.ge.s32.totalorder %s4482_s27, 4   ;;  %s4486_s25 = smov %s4483_s9 }
0x143c   :  { %30 = sbr.rel (!%p28_p6) target bundleno = 15 (0xf), region = 161 }
0x1443   :  { %2474 = vsyncpa [#allocation3], 1 }
0x1444   :  { %2476 = vsyncpa [#allocation3 + $0x1], 1 }
0x1445   :  { %2477 = vsyncpa [#allocation6], 1 }
0x1446   :  { %2479 = vsyncpa [#allocation6 + $0x1], 1 }
0x1447   :  { %2480 = vsyncpa [#allocation9], 1 }
0x1448   :  { %2481 = vsyncpa [#allocation4], 1 }
0x1449   :  { %2483 = vsyncpa [#allocation4 + $0x1], 1 }
0x144a   :  { %2484 = vsyncpa [#allocation14], 1 }
0x144b   :  { %2486 = vsyncpa [#allocation14 + $0x1], 1 }

</bundles_post_ra>
